<compile_context>
chip_gen: v7x
topology: tpu7x:2x2x1
jax: 0.10.0
libtpu: 0.0.40
codegen_flags: <defaults>
</compile_context>

<pallas_src>
import math
import functools

import jax
import jax.numpy as jnp
from jax.experimental import pallas as pl
from jax.experimental.pallas import tpu as pltpu

EPS = 1e-5                       # nn.LayerNorm default eps
COMPUTE_DTYPE = jnp.bfloat16     # MXU operand dtype (accumulation stays f32)


# ---------------------------------------------------------------------------
# per-generation configuration
# ---------------------------------------------------------------------------
def default_config():
    try:
        kind = jax.devices()[0].device_kind.lower()
    except Exception:  # pragma: no cover
        kind = ""
    big_vmem = ("v7" not in kind) and any(t in kind for t in ("v4", "v5", "v6"))
    if big_vmem:
        # 128 MiB VMEM parts (v4/v5e/v5p/v6e): large tiles, raised scoped limit.
        return dict(vmem_limit_bytes=100 * 1024 * 1024,
                    seq_tile=512, attn_q_tile=512, attn_kv_tile=1024,
                    ffn_seq_tile=1024, ff_tile=2048,
                    out_seq_tile=1024, vocab_tile=1024, head_group=None)
    # v7x (64 MiB VMEM) or unknown generation: conservative limit; spend VMEM on
    # tiles that cut weight re-streaming rather than on huge activation blocks.
    return dict(vmem_limit_bytes=48 * 1024 * 1024,
                seq_tile=512, attn_q_tile=256, attn_kv_tile=512,
                ffn_seq_tile=512, ff_tile=1024,
                out_seq_tile=512, vocab_tile=512, head_group=None)


# ---------------------------------------------------------------------------
# helpers
# ---------------------------------------------------------------------------
def _layer_norm(x, gamma, beta):
    x = x.astype(jnp.float32)
    mu = jnp.mean(x, axis=-1, keepdims=True)
    var = jnp.mean(jnp.square(x - mu), axis=-1, keepdims=True)
    return (x - mu) * jax.lax.rsqrt(var + EPS) * gamma + beta


def _pick_tile(dim, target, align):
    """Largest t <= target with t % align == 0 and dim % t == 0, else full dim."""
    if dim <= target:
        return dim
    t = (target // align) * align
    while t >= align:
        if dim % t == 0:
            return t
        t -= align
    return dim


def _pick_group(num_heads, head_dim, target=512):
    """Heads per reduction step in the attn-out contraction (HG*Dh ~ target)."""
    g = max(1, min(num_heads, target // max(head_dim, 1)))
    while num_heads % g:
        g -= 1
    return g


def _cparams(semantics, cfg):
    return pltpu.CompilerParams(dimension_semantics=semantics,
                                vmem_limit_bytes=cfg["vmem_limit_bytes"])


def _bcast_spec(shape, grid_rank):
    zeros = (0,) * len(shape)
    if grid_rank == 2:
        return pl.BlockSpec(shape, lambda i, j: zeros)
    if grid_rank == 3:
        return pl.BlockSpec(shape, lambda i, j, k: zeros)
    return pl.BlockSpec(shape, lambda i, j, k, l: zeros)


# ---------------------------------------------------------------------------
# kernels
# ---------------------------------------------------------------------------
def embed_ln_kernel(tok_ref, pos_ref, g_ref, b_ref, out_ref):
    # tok: (1, TS, E)  pos: (TS, E)  g/b: (1, E)  out: (1, TS, E)
    x = tok_ref[0] + pos_ref[...]
    out_ref[0] = _layer_norm(x, g_ref[...], b_ref[...])


def qkv_kernel(x_ref, wq_ref, wk_ref, wv_ref, bq_ref, bk_ref, bv_ref,
               q_ref, k_ref, v_ref):
    # x: (1, TS, E) f32   w*: (1, E, Dh) bf16 (Q pre-scaled)   b*: (1, 1, Dh) f32
    # outputs: (1, 1, TS, Dh) bf16 head-major — whole-tile stores, no lane masks.
    x = x_ref[0].astype(COMPUTE_DTYPE)
    q = jnp.dot(x, wq_ref[0], preferred_element_type=jnp.float32) + bq_ref[0]
    k = jnp.dot(x, wk_ref[0], preferred_element_type=jnp.float32) + bk_ref[0]
    v = jnp.dot(x, wv_ref[0], preferred_element_type=jnp.float32) + bv_ref[0]
    q_ref[0, 0] = q.astype(q_ref.dtype)
    k_ref[0, 0] = k.astype(k_ref.dtype)
    v_ref[0, 0] = v.astype(v_ref.dtype)


def flash_attn_kernel(q_ref, k_ref, v_ref, o_ref, m_sc, l_sc, acc_sc):
    # q: (1, 1, TQ, Dh) bf16 (already scaled)   k/v: (1, 1, TK, Dh) bf16
    # scratch: m/l (TQ, 1) f32, acc (TQ, Dh) f32 — all whole-tile updates.
    ki = pl.program_id(3)

    @pl.when(ki == 0)
    def _():
        m_sc[...] = jnp.full_like(m_sc, -jnp.inf)
        l_sc[...] = jnp.zeros_like(l_sc)
        acc_sc[...] = jnp.zeros_like(acc_sc)

    q = q_ref[0, 0]
    k = k_ref[0, 0]
    v = v_ref[0, 0]

    s = jax.lax.dot_general(q, k, (((1,), (1,)), ((), ())),
                            preferred_element_type=jnp.float32)      # (TQ, TK)
    m_prev = m_sc[...]
    m_new = jnp.maximum(m_prev, jnp.max(s, axis=-1, keepdims=True))
    alpha = jnp.exp(m_prev - m_new)
    p = jnp.exp(s - m_new)
    l_sc[...] = alpha * l_sc[...] + jnp.sum(p, axis=-1, keepdims=True)
    acc_sc[...] = alpha * acc_sc[...] + jnp.dot(
        p.astype(v.dtype), v, preferred_element_type=jnp.float32)
    m_sc[...] = m_new

    @pl.when(ki == pl.num_programs(3) - 1)
    def _():
        inv = pl.reciprocal(l_sc[...], approx=True)
        o_ref[0, 0] = (acc_sc[...] * inv).astype(o_ref.dtype)


def attn_out_ln_kernel(x_ref, ctx_ref, ow_ref, ob_ref, g_ref, b_ref,
                       out_ref, acc_ref, *, heads_per_step):
    # x: (1, TS, E) f32 residual   ctx: (1, HG, TS, Dh) bf16
    # ow: (HG, Dh, E) bf16   acc: (TS, E) f32 — E-contraction tiled over heads.
    hi = pl.program_id(2)

    @pl.when(hi == 0)
    def _():
        acc_ref[...] = jnp.zeros_like(acc_ref)

    acc = acc_ref[...]
    for h in range(heads_per_step):                  # static unroll
        acc = acc + jnp.dot(ctx_ref[0, h], ow_ref[h],
                            preferred_element_type=jnp.float32)
    acc_ref[...] = acc

    @pl.when(hi == pl.num_programs(2) - 1)
    def _():
        y = x_ref[0] + acc_ref[...] + ob_ref[...]
        out_ref[0] = _layer_norm(y, g_ref[...], b_ref[...])


def ffn_ln_kernel(x_ref, w1_ref, b1_ref, w2_ref, b2_ref, g_ref, bln_ref,
                  out_ref, acc_ref):
    # x: (1, TS, E) f32   w1: (E, TF) bf16   w2: (TF, E) bf16   acc: (TS, E) f32
    fi = pl.program_id(2)

    @pl.when(fi == 0)
    def _():
        acc_ref[...] = jnp.zeros_like(acc_ref)

    x = x_ref[0].astype(COMPUTE_DTYPE)
    h = jnp.maximum(
        jnp.dot(x, w1_ref[...], preferred_element_type=jnp.float32) + b1_ref[...],
        0.0)
    acc_ref[...] += jnp.dot(h.astype(COMPUTE_DTYPE), w2_ref[...],
                            preferred_element_type=jnp.float32)

    @pl.when(fi == pl.num_programs(2) - 1)
    def _():
        y = x_ref[0] + acc_ref[...] + b2_ref[...]
        out_ref[0] = _layer_norm(y, g_ref[...], bln_ref[...])


def out_proj_kernel(x_ref, w_ref, b_ref, o_ref):
    # x: (1, TS, E) f32   w: (E, TV) bf16   b: (1, TV) f32   o: (1, TS, TV) f32
    x = x_ref[0].astype(COMPUTE_DTYPE)
    o_ref[0] = (jnp.dot(x, w_ref[...], preferred_element_type=jnp.float32)
                + b_ref[...]).astype(o_ref.dtype)


# ---------------------------------------------------------------------------
# pallas_call wrappers
# ---------------------------------------------------------------------------
def embed_layernorm(tok_emb, pos_emb, gamma, beta, cfg):
    B, S, E = tok_emb.shape
    TS = _pick_tile(S, cfg["seq_tile"], 16)
    return pl.pallas_call(
        embed_ln_kernel,
        out_shape=jax.ShapeDtypeStruct((B, S, E), jnp.float32),
        grid=(B, S // TS),
        in_specs=[pl.BlockSpec((1, TS, E), lambda bi, si: (bi, si, 0)),
                  pl.BlockSpec((TS, E), lambda bi, si: (si, 0)),
                  _bcast_spec(gamma.shape, 2), _bcast_spec(beta.shape, 2)],
        out_specs=pl.BlockSpec((1, TS, E), lambda bi, si: (bi, si, 0)),
        compiler_params=_cparams(("parallel", "parallel"), cfg),
    )(tok_emb, pos_emb, gamma, beta)


def qkv_projection(x, wq, wk, wv, bq, bk, bv, cfg):
    B, S, E = x.shape
    H, _, Dh = wq.shape
    TS = _pick_tile(S, cfg["seq_tile"], 16)
    act_spec = pl.BlockSpec((1, TS, E), lambda bi, si, hi: (bi, si, 0))
    w_spec = pl.BlockSpec((1, E, Dh), lambda bi, si, hi: (hi, 0, 0))
    b_spec = pl.BlockSpec((1, 1, Dh), lambda bi, si, hi: (hi, 0, 0))
    out_spec = pl.BlockSpec((1, 1, TS, Dh), lambda bi, si, hi: (bi, hi, si, 0))
    out = jax.ShapeDtypeStruct((B, H, S, Dh), COMPUTE_DTYPE)
    return pl.pallas_call(
        qkv_kernel,
        out_shape=(out, out, out),
        grid=(B, S // TS, H),
        in_specs=[act_spec, w_spec, w_spec, w_spec, b_spec, b_spec, b_spec],
        out_specs=(out_spec, out_spec, out_spec),
        compiler_params=_cparams(("parallel", "parallel", "parallel"), cfg),
    )(x, wq, wk, wv, bq, bk, bv)


def flash_attention(q, k, v, cfg):
    B, H, S, Dh = q.shape
    TQ = _pick_tile(S, cfg["attn_q_tile"], 16)
    TK = _pick_tile(S, cfg["attn_kv_tile"], 16)
    q_spec = pl.BlockSpec((1, 1, TQ, Dh), lambda bi, hi, qi, ki: (bi, hi, qi, 0))
    kv_spec = pl.BlockSpec((1, 1, TK, Dh), lambda bi, hi, qi, ki: (bi, hi, ki, 0))
    return pl.pallas_call(
        flash_attn_kernel,
        out_shape=jax.ShapeDtypeStruct((B, H, S, Dh), COMPUTE_DTYPE),
        grid=(B, H, S // TQ, S // TK),
        in_specs=[q_spec, kv_spec, kv_spec],
        out_specs=q_spec,
        scratch_shapes=[pltpu.VMEM((TQ, 1), jnp.float32),
                        pltpu.VMEM((TQ, 1), jnp.float32),
                        pltpu.VMEM((TQ, Dh), jnp.float32)],
        compiler_params=_cparams(
            ("parallel", "parallel", "parallel", "arbitrary"), cfg),
    )(q, k, v)


def attn_out_residual_ln(x, ctx, ow, ob, gamma, beta, cfg):
    B, S, E = x.shape
    _, H, _, Dh = ctx.shape
    TS = _pick_tile(S, cfg["seq_tile"], 16)
    HG = cfg.get("head_group") or _pick_group(H, Dh)
    HG = max(1, min(HG, H))
    while H % HG:
        HG -= 1
    kernel = functools.partial(attn_out_ln_kernel, heads_per_step=HG)
    x_spec = pl.BlockSpec((1, TS, E), lambda bi, si, hi: (bi, si, 0))
    ctx_spec = pl.BlockSpec((1, HG, TS, Dh), lambda bi, si, hi: (bi, hi, si, 0))
    ow_spec = pl.BlockSpec((HG, Dh, E), lambda bi, si, hi: (hi, 0, 0))
    return pl.pallas_call(
        kernel,
        out_shape=jax.ShapeDtypeStruct((B, S, E), jnp.float32),
        grid=(B, S // TS, H // HG),
        in_specs=[x_spec, ctx_spec, ow_spec,
                  _bcast_spec(ob.shape, 3), _bcast_spec(gamma.shape, 3),
                  _bcast_spec(beta.shape, 3)],
        out_specs=x_spec,
        scratch_shapes=[pltpu.VMEM((TS, E), jnp.float32)],
        compiler_params=_cparams(("parallel", "parallel", "arbitrary"), cfg),
    )(x, ctx, ow, ob, gamma, beta)


def ffn_residual_ln(x, w1, b1, w2, b2, gamma, beta, cfg):
    B, S, E = x.shape
    F = w1.shape[1]
    TS = _pick_tile(S, cfg["ffn_seq_tile"], 16)
    TF = _pick_tile(F, cfg["ff_tile"], 128)
    act_spec = pl.BlockSpec((1, TS, E), lambda bi, si, fi: (bi, si, 0))
    return pl.pallas_call(
        ffn_ln_kernel,
        out_shape=jax.ShapeDtypeStruct((B, S, E), jnp.float32),
        grid=(B, S // TS, F // TF),
        in_specs=[act_spec,
                  pl.BlockSpec((E, TF), lambda bi, si, fi: (0, fi)),
                  pl.BlockSpec((1, TF), lambda bi, si, fi: (0, fi)),
                  pl.BlockSpec((TF, E), lambda bi, si, fi: (fi, 0)),
                  _bcast_spec(b2.shape, 3), _bcast_spec(gamma.shape, 3),
                  _bcast_spec(beta.shape, 3)],
        out_specs=act_spec,
        scratch_shapes=[pltpu.VMEM((TS, E), jnp.float32)],
        compiler_params=_cparams(("parallel", "parallel", "arbitrary"), cfg),
    )(x, w1, b1, w2, b2, gamma, beta)


def output_projection(x, w, bias, cfg):
    B, S, E = x.shape
    V = w.shape[1]
    TS = _pick_tile(S, cfg["out_seq_tile"], 16)
    TV = _pick_tile(V, cfg["vocab_tile"], 128)
    return pl.pallas_call(
        out_proj_kernel,
        out_shape=jax.ShapeDtypeStruct((B, S, V), jnp.float32),
        grid=(B, S // TS, V // TV),
        in_specs=[pl.BlockSpec((1, TS, E), lambda bi, si, vi: (bi, si, 0)),
                  pl.BlockSpec((E, TV), lambda bi, si, vi: (0, vi)),
                  pl.BlockSpec((1, TV), lambda bi, si, vi: (0, vi))],
        out_specs=pl.BlockSpec((1, TS, TV), lambda bi, si, vi: (bi, si, vi)),
        compiler_params=_cparams(("parallel", "parallel", "parallel"), cfg),
    )(x, w, bias)


def language_model_forward(token_ids, p, cfg):
    # Embedding lookups are gathers -> plain JAX glue feeding the Pallas path.
    S = token_ids.shape[1]
    tok_emb = jnp.take(p["tok_emb"], token_ids, axis=0)          # (B, S, E)
    pos_emb = p["pos_emb"][:S]                                   # (S, E)
    x = embed_layernorm(tok_emb, pos_emb, p["emb_ln_g"], p["emb_ln_b"], cfg)
    for lp in p["layers"]:
        q, k, v = qkv_projection(x, lp["wq"], lp["wk"], lp["wv"],
                                 lp["bq"], lp["bk"], lp["bv"], cfg)
        ctx = flash_attention(q, k, v, cfg)
        x1 = attn_out_residual_ln(x, ctx, lp["ow"], lp["ob"],
                                  lp["ln1g"], lp["ln1b"], cfg)
        x = ffn_residual_ln(x1, lp["w1"], lp["b1"], lp["w2"], lp["b2"],
                            lp["ln2g"], lp["ln2b"], cfg)
    return output_projection(x, p["out_w"], p["out_b"], cfg)


# ---------------------------------------------------------------------------
# parameter init / prep + pure-JAX reference
# ---------------------------------------------------------------------------
def init_params(key, vocab_size, embed_dim, max_seq_len, ff_dim, num_layers):
    def nrm(k, shape, s=0.02):
        return (s * jax.random.normal(k, shape)).astype(jnp.float32)

    keys = jax.random.split(key, 4 + num_layers)
    params = {
        "tok_emb": nrm(keys[0], (vocab_size, embed_dim), 1.0),
        "pos_emb": nrm(keys[1], (max_seq_len, embed_dim), 1.0),
        "emb_ln_g": jnp.ones((1, embed_dim), jnp.float32),
        "emb_ln_b": jnp.zeros((1, embed_dim), jnp.float32),
        "out_w": nrm(keys[2], (embed_dim, vocab_size)),
        "out_b": nrm(keys[3], (1, vocab_size)),
        "layers": [],
    }
    for li in range(num_layers):
        lk = jax.random.split(keys[4 + li], 12)
        params["layers"].append({
            "qw": nrm(lk[0], (embed_dim, embed_dim)), "qb": nrm(lk[1], (1, embed_dim)),
            "kw": nrm(lk[2], (embed_dim, embed_dim)), "kb": nrm(lk[3], (1, embed_dim)),
            "vw": nrm(lk[4], (embed_dim, embed_dim)), "vb": nrm(lk[5], (1, embed_dim)),
            "ow": nrm(lk[6], (embed_dim, embed_dim)), "ob": nrm(lk[7], (1, embed_dim)),
            "ln1g": jnp.ones((1, embed_dim), jnp.float32),
            "ln1b": jnp.zeros((1, embed_dim), jnp.float32),
            "w1": nrm(lk[8], (embed_dim, ff_dim)), "b1": nrm(lk[9], (1, ff_dim)),
            "w2": nrm(lk[10], (ff_dim, embed_dim)), "b2": nrm(lk[11], (1, embed_dim)),
            "ln2g": jnp.ones((1, embed_dim), jnp.float32),
            "ln2b": jnp.zeros((1, embed_dim), jnp.float32),
        })
    return params


def prepare_params(params, num_heads):
    """One-time prep: head-major Q/K/V/out weights (scale folded into Q), bf16
    matmul weights; LayerNorm params / biases / residual path stay f32."""
    E = params["pos_emb"].shape[1]
    H = num_heads
    Dh = E // H
    inv_scale = 1.0 / math.sqrt(Dh)

    def hm_w(w):                     # (E, E) -> (H, E, Dh)
        return jnp.transpose(w.reshape(E, H, Dh), (1, 0, 2))

    def hm_b(b):                     # (1, E) -> (H, 1, Dh)
        return b.reshape(H, 1, Dh)

    prep = {
        "tok_emb": params["tok_emb"],
        "pos_emb": params["pos_emb"],
        "emb_ln_g": params["emb_ln_g"],
        "emb_ln_b": params["emb_ln_b"],
        "out_w": params["out_w"].astype(COMPUTE_DTYPE),
        "out_b": params["out_b"],
        "layers": [],
    }
    for lp in params["layers"]:
        prep["layers"].append({
            "wq": hm_w(lp["qw"] * inv_scale).astype(COMPUTE_DTYPE),
            "bq": hm_b(lp["qb"] * inv_scale),
            "wk": hm_w(lp["kw"]).astype(COMPUTE_DTYPE), "bk": hm_b(lp["kb"]),
            "wv": hm_w(lp["vw"]).astype(COMPUTE_DTYPE), "bv": hm_b(lp["vb"]),
            "ow": lp["ow"].reshape(H, Dh, E).astype(COMPUTE_DTYPE), "ob": lp["ob"],
            "ln1g": lp["ln1g"], "ln1b": lp["ln1b"],
            "w1": lp["w1"].astype(COMPUTE_DTYPE), "b1": lp["b1"],
            "w2": lp["w2"].astype(COMPUTE_DTYPE), "b2": lp["b2"],
            "ln2g": lp["ln2g"], "ln2b": lp["ln2b"],
        })
    return prep


def reference_forward(token_ids, params, num_heads, matmul_dtype=jnp.float32):
    """Pure-JAX reference. matmul_dtype=f32 -> exact PyTorch math;
    matmul_dtype=bf16 -> mirrors the kernel's bf16-operand / f32-accum matmuls."""
    def mm(a, b):
        return jnp.dot(a.astype(matmul_dtype), b.astype(matmul_dtype),
                       preferred_element_type=jnp.float32)

    def ln(x, g, b):
        mu = x.mean(-1, keepdims=True)
        var = ((x - mu) ** 2).mean(-1, keepdims=True)
        return (x - mu) / jnp.sqrt(var + EPS) * g + b

    tok = params["tok_emb"][token_ids]
    pos = params["pos_emb"][jnp.arange(token_ids.shape[1])]
    x = ln(tok + pos, params["emb_ln_g"], params["emb_ln_b"])
    B, S, E = x.shape
    H = num_heads
    Dh = E // H
    for lp in params["layers"]:
        q = (mm(x, lp["qw"]) + lp["qb"]).astype(matmul_dtype)
        k = (mm(x, lp["kw"]) + lp["kb"]).astype(matmul_dtype)
        v = (mm(x, lp["vw"]) + lp["vb"]).astype(matmul_dtype)
        q = q.reshape(B, S, H, Dh).transpose(0, 2, 1, 3)
        k = k.reshape(B, S, H, Dh).transpose(0, 2, 1, 3)
        v = v.reshape(B, S, H, Dh).transpose(0, 2, 1, 3)
        scores = jnp.einsum("bhqd,bhkd->bhqk", q.astype(jnp.float32),
                            k.astype(jnp.float32)) / math.sqrt(Dh)
        attn = jax.nn.softmax(scores, axis=-1)
        ctx = jnp.einsum("bhqk,bhkd->bhqd", attn.astype(matmul_dtype), v,
                         preferred_element_type=jnp.float32)
        ctx = ctx.transpose(0, 2, 1, 3).reshape(B, S, E).astype(matmul_dtype)
        x1 = ln(x + mm(ctx, lp["ow"]) + lp["ob"], lp["ln1g"], lp["ln1b"])
        h1 = jnp.maximum(mm(x1, lp["w1"]) + lp["b1"], 0.0)
        ff = mm(h1, lp["w2"]) + lp["b2"]
        x = ln(x1 + ff, lp["ln2g"], lp["ln2b"])
    return mm(x, params["out_w"]) + params["out_b"]


# ---------------------------------------------------------------------------
if __name__ == "__main__":
    base_cfg = default_config()

    def run_case(vocab, E, max_seq, H, F, L, B, S, tile_overrides, key, name):
        kp, kt = jax.random.split(key)
        params = init_params(kp, vocab, E, max_seq, F, L)
        token_ids = jax.random.randint(kt, (B, S), 0, vocab, dtype=jnp.int32)
        prepared = prepare_params(params, H)
        cfg = dict(base_cfg)
        cfg.update(tile_overrides)
        fwd = jax.jit(functools.partial(language_model_forward, cfg=cfg))
        logits = jax.block_until_ready(fwd(token_ids, prepared))
        assert logits.shape == (B, S, vocab), name
        # Tight check vs a reference using the same bf16-operand matmuls.
        ref_bf16 = reference_forward(token_ids, params, H, jnp.bfloat16)
        assert jnp.allclose(logits, ref_bf16, atol=1e-2, rtol=1e-2), \
            f"{name}: mismatch vs bf16-matmul reference"
        # Looser sanity check vs the exact f32 (PyTorch-semantics) reference.
        ref_f32 = reference_forward(token_ids, params, H, jnp.float32)
        assert jnp.allclose(logits, ref_f32, atol=5e-2, rtol=5e-2), \
            f"{name}: mismatch vs f32 reference"

    key = jax.random.PRNGKey(0)
    k1, k2 = jax.random.split(key)

    # 1) Small single-tile case (shapes implied by the module; everything fits
    #    one block per kernel).
    run_case(vocab=128, E=32, max_seq=16, H=4, F=64, L=2, B=2, S=8,
             tile_overrides={}, key=k1, name="small")

    # 2) Multi-tile case: forces multiple seq/kv/ff/vocab/head-group tiles so
    #    the grid-reduction + revisited-output paths are actually exercised.
    run_case(vocab=256, E=32, max_seq=64, H=4, F=256, L=2, B=2, S=32,
             tile_overrides=dict(seq_tile=16, attn_q_tile=16, attn_kv_tile=16,
                                 ffn_seq_tile=16, ff_tile=128, out_seq_tile=16,
                                 vocab_tile=128, head_group=1),
             key=k2, name="tiled")

    print("KERNEL_OK")
</pallas_src>

<mosaic_0001>
module attributes {stable_mosaic.version = 11 : i64} {
  func.func @embed_ln_kernel(%arg0: i32, %arg1: i32, %arg2: memref<1x8x32xf32, #tpu.memory_space<vmem>>, %arg3: memref<8x32xf32, #tpu.memory_space<vmem>>, %arg4: memref<1x32xf32, #tpu.memory_space<vmem>>, %arg5: memref<1x32xf32, #tpu.memory_space<vmem>>, %arg6: memref<1x8x32xf32, #tpu.memory_space<vmem>>) attributes {dimension_semantics = [#tpu.dimension_semantics<parallel>, #tpu.dimension_semantics<parallel>], iteration_bounds = array<i64: 2, 1>, scalar_prefetch = 0 : i64, scratch_operands = 0 : i64, tpu.core_type = #tpu.core_type<tc>, window_params = [{transform_indices = @transform_0, window_bounds = array<i64: 1, 8, 32>}, {transform_indices = @transform_1, window_bounds = array<i64: 8, 32>}, {pipeline_mode = #tpu.pipeline_mode<synchronous>, transform_indices = @transform_2, window_bounds = array<i64: 1, 32>}, {pipeline_mode = #tpu.pipeline_mode<synchronous>, transform_indices = @transform_3, window_bounds = array<i64: 1, 32>}, {transform_indices = @transform_4, window_bounds = array<i64: 1, 8, 32>}]} {
    %c0 = arith.constant 0 : index
    %c0_0 = arith.constant 0 : index
    %c0_1 = arith.constant 0 : index
    %0 = vector.load %arg2[%c0, %c0_0, %c0_1] : memref<1x8x32xf32, #tpu.memory_space<vmem>>, vector<1x8x32xf32>
    %1 = vector.shape_cast %0 : vector<1x8x32xf32> to vector<8x32xf32>
    %c0_2 = arith.constant 0 : index
    %c0_3 = arith.constant 0 : index
    %2 = vector.load %arg3[%c0_2, %c0_3] : memref<8x32xf32, #tpu.memory_space<vmem>>, vector<8x32xf32>
    %3 = arith.addf %1, %2 : vector<8x32xf32>
    %c0_4 = arith.constant 0 : index
    %c0_5 = arith.constant 0 : index
    %4 = vector.load %arg4[%c0_4, %c0_5] : memref<1x32xf32, #tpu.memory_space<vmem>>, vector<1x32xf32>
    %c0_6 = arith.constant 0 : index
    %c0_7 = arith.constant 0 : index
    %5 = vector.load %arg5[%c0_6, %c0_7] : memref<1x32xf32, #tpu.memory_space<vmem>>, vector<1x32xf32>
    %cst = arith.constant dense<0.000000e+00> : vector<8xf32>
    %6 = vector.multi_reduction <add>, %3, %cst [1] : vector<8x32xf32> to vector<8xf32>
    %7 = vector.shape_cast %6 : vector<8xf32> to vector<8x1xf32>
    %cst_8 = arith.constant 3.200000e+01 : f32
    %8 = vector.broadcast %cst_8 : f32 to vector<8x1xf32>
    %9 = arith.divf %7, %8 : vector<8x1xf32>
    %10 = vector.broadcast %9 : vector<8x1xf32> to vector<8x32xf32>
    %11 = arith.subf %3, %10 : vector<8x32xf32>
    %12 = arith.mulf %11, %11 : vector<8x32xf32>
    %cst_9 = arith.constant dense<0.000000e+00> : vector<8xf32>
    %13 = vector.multi_reduction <add>, %12, %cst_9 [1] : vector<8x32xf32> to vector<8xf32>
    %14 = vector.shape_cast %13 : vector<8xf32> to vector<8x1xf32>
    %cst_10 = arith.constant 3.200000e+01 : f32
    %15 = vector.broadcast %cst_10 : f32 to vector<8x1xf32>
    %16 = arith.divf %14, %15 : vector<8x1xf32>
    %17 = vector.broadcast %9 : vector<8x1xf32> to vector<8x32xf32>
    %18 = arith.subf %3, %17 : vector<8x32xf32>
    %cst_11 = arith.constant 9.99999974E-6 : f32
    %19 = vector.broadcast %cst_11 : f32 to vector<8x1xf32>
    %20 = arith.addf %16, %19 : vector<8x1xf32>
    %21 = math.rsqrt %20 : vector<8x1xf32>
    %22 = vector.broadcast %21 : vector<8x1xf32> to vector<8x32xf32>
    %23 = arith.mulf %18, %22 : vector<8x32xf32>
    %24 = vector.broadcast %4 : vector<1x32xf32> to vector<8x32xf32>
    %25 = arith.mulf %23, %24 : vector<8x32xf32>
    %26 = vector.broadcast %5 : vector<1x32xf32> to vector<8x32xf32>
    %27 = arith.addf %25, %26 : vector<8x32xf32>
    %c0_12 = arith.constant 0 : index
    %c0_13 = arith.constant 0 : index
    %c0_14 = arith.constant 0 : index
    %28 = vector.load %arg6[%c0_12, %c0_13, %c0_14] : memref<1x8x32xf32, #tpu.memory_space<vmem>>, vector<1x8x32xf32>
    %29 = vector.shape_cast %28 : vector<1x8x32xf32> to vector<8x32xf32>
    %30 = vector.shape_cast %27 : vector<8x32xf32> to vector<1x8x32xf32>
    tpu.vector_store %arg6[%c0_12, %c0_13, %c0_14], %30 {strides = array<i32>} : memref<1x8x32xf32, #tpu.memory_space<vmem>>, vector<1x8x32xf32>,
    return
  }
  func.func @transform_0(%arg0: i32, %arg1: i32) -> (i32, i32, i32) {
    %c0_i32 = arith.constant 0 : i32
    %c0_i32_0 = arith.constant 0 : i32
    return %arg0, %arg1, %c0_i32 : i32, i32, i32
  }
  func.func @transform_1(%arg0: i32, %arg1: i32) -> (i32, i32) {
    %c0_i32 = arith.constant 0 : i32
    %c0_i32_0 = arith.constant 0 : i32
    return %arg1, %c0_i32 : i32, i32
  }
  func.func @transform_2(%arg0: i32, %arg1: i32) -> (i32, i32) {
    %c0_i32 = arith.constant 0 : i32
    %c0_i32_0 = arith.constant 0 : i32
    %c0_i32_1 = arith.constant 0 : i32
    return %c0_i32, %c0_i32_0 : i32, i32
  }
  func.func @transform_3(%arg0: i32, %arg1: i32) -> (i32, i32) {
    %c0_i32 = arith.constant 0 : i32
    %c0_i32_0 = arith.constant 0 : i32
    %c0_i32_1 = arith.constant 0 : i32
    return %c0_i32, %c0_i32_0 : i32, i32
  }
  func.func @transform_4(%arg0: i32, %arg1: i32) -> (i32, i32, i32) {
    %c0_i32 = arith.constant 0 : i32
    %c0_i32_0 = arith.constant 0 : i32
    return %arg0, %arg1, %c0_i32 : i32, i32, i32
  }
}

module attributes {stable_mosaic.version = 11 : i64} {
  func.func @qkv_kernel(%arg0: i32, %arg1: i32, %arg2: i32, %arg3: memref<1x8x32xf32, #tpu.memory_space<vmem>>, %arg4: memref<1x32x8xbf16, #tpu.memory_space<vmem>>, %arg5: memref<1x32x8xbf16, #tpu.memory_space<vmem>>, %arg6: memref<1x32x8xbf16, #tpu.memory_space<vmem>>, %arg7: memref<1x1x8xf32, #tpu.memory_space<vmem>>, %arg8: memref<1x1x8xf32, #tpu.memory_space<vmem>>, %arg9: memref<1x1x8xf32, #tpu.memory_space<vmem>>, %arg10: memref<1x1x8x8xbf16, #tpu.memory_space<vmem>>, %arg11: memref<1x1x8x8xbf16, #tpu.memory_space<vmem>>, %arg12: memref<1x1x8x8xbf16, #tpu.memory_space<vmem>>) attributes {dimension_semantics = [#tpu.dimension_semantics<parallel>, #tpu.dimension_semantics<parallel>, #tpu.dimension_semantics<parallel>], iteration_bounds = array<i64: 2, 1, 4>, scalar_prefetch = 0 : i64, scratch_operands = 0 : i64, tpu.core_type = #tpu.core_type<tc>, window_params = [{transform_indices = @transform_0, window_bounds = array<i64: 1, 8, 32>}, {transform_indices = @transform_1, window_bounds = array<i64: 1, 32, 8>}, {transform_indices = @transform_2, window_bounds = array<i64: 1, 32, 8>}, {transform_indices = @transform_3, window_bounds = array<i64: 1, 32, 8>}, {transform_indices = @transform_4, window_bounds = array<i64: 1, 1, 8>}, {transform_indices = @transform_5, window_bounds = array<i64: 1, 1, 8>}, {transform_indices = @transform_6, window_bounds = array<i64: 1, 1, 8>}, {transform_indices = @transform_7, window_bounds = array<i64: 1, 1, 8, 8>}, {transform_indices = @transform_8, window_bounds = array<i64: 1, 1, 8, 8>}, {transform_indices = @transform_9, window_bounds = array<i64: 1, 1, 8, 8>}]} {
    %c0 = arith.constant 0 : index
    %c0_0 = arith.constant 0 : index
    %c0_1 = arith.constant 0 : index
    %0 = vector.load %arg3[%c0, %c0_0, %c0_1] : memref<1x8x32xf32, #tpu.memory_space<vmem>>, vector<1x8x32xf32>
    %1 = vector.shape_cast %0 : vector<1x8x32xf32> to vector<8x32xf32>
    %2 = arith.truncf %1 : vector<8x32xf32> to vector<8x32xbf16>
    %c0_2 = arith.constant 0 : index
    %c0_3 = arith.constant 0 : index
    %c0_4 = arith.constant 0 : index
    %3 = vector.load %arg4[%c0_2, %c0_3, %c0_4] : memref<1x32x8xbf16, #tpu.memory_space<vmem>>, vector<1x32x8xbf16>
    %4 = vector.shape_cast %3 : vector<1x32x8xbf16> to vector<32x8xbf16>
    %cst = arith.constant dense<0.000000e+00> : vector<8x8xf32>
    %5 = tpu.matmul %2, %4, %cst {dimension_numbers = #tpu.dot_dimension_numbers<[1], [0], [0], [1], [0, 0, 1, 1], [], []>} : vector<8x32xbf16>, vector<32x8xbf16>, vector<8x8xf32> -> vector<8x8xf32>
    %c0_5 = arith.constant 0 : index
    %c0_6 = arith.constant 0 : index
    %c0_7 = arith.constant 0 : index
    %6 = vector.load %arg7[%c0_5, %c0_6, %c0_7] : memref<1x1x8xf32, #tpu.memory_space<vmem>>, vector<1x1x8xf32>
    %7 = vector.shape_cast %6 : vector<1x1x8xf32> to vector<1x8xf32>
    %8 = vector.broadcast %7 : vector<1x8xf32> to vector<8x8xf32>
    %9 = arith.addf %5, %8 : vector<8x8xf32>
    %c0_8 = arith.constant 0 : index
    %c0_9 = arith.constant 0 : index
    %c0_10 = arith.constant 0 : index
    %10 = vector.load %arg5[%c0_8, %c0_9, %c0_10] : memref<1x32x8xbf16, #tpu.memory_space<vmem>>, vector<1x32x8xbf16>
    %11 = vector.shape_cast %10 : vector<1x32x8xbf16> to vector<32x8xbf16>
    %cst_11 = arith.constant dense<0.000000e+00> : vector<8x8xf32>
    %12 = tpu.matmul %2, %11, %cst_11 {dimension_numbers = #tpu.dot_dimension_numbers<[1], [0], [0], [1], [0, 0, 1, 1], [], []>} : vector<8x32xbf16>, vector<32x8xbf16>, vector<8x8xf32> -> vector<8x8xf32>
    %c0_12 = arith.constant 0 : index
    %c0_13 = arith.constant 0 : index
    %c0_14 = arith.constant 0 : index
    %13 = vector.load %arg8[%c0_12, %c0_13, %c0_14] : memref<1x1x8xf32, #tpu.memory_space<vmem>>, vector<1x1x8xf32>
    %14 = vector.shape_cast %13 : vector<1x1x8xf32> to vector<1x8xf32>
    %15 = vector.broadcast %14 : vector<1x8xf32> to vector<8x8xf32>
    %16 = arith.addf %12, %15 : vector<8x8xf32>
    %c0_15 = arith.constant 0 : index
    %c0_16 = arith.constant 0 : index
    %c0_17 = arith.constant 0 : index
    %17 = vector.load %arg6[%c0_15, %c0_16, %c0_17] : memref<1x32x8xbf16, #tpu.memory_space<vmem>>, vector<1x32x8xbf16>
    %18 = vector.shape_cast %17 : vector<1x32x8xbf16> to vector<32x8xbf16>
    %cst_18 = arith.constant dense<0.000000e+00> : vector<8x8xf32>
    %19 = tpu.matmul %2, %18, %cst_18 {dimension_numbers = #tpu.dot_dimension_numbers<[1], [0], [0], [1], [0, 0, 1, 1], [], []>} : vector<8x32xbf16>, vector<32x8xbf16>, vector<8x8xf32> -> vector<8x8xf32>
    %c0_19 = arith.constant 0 : index
    %c0_20 = arith.constant 0 : index
    %c0_21 = arith.constant 0 : index
    %20 = vector.load %arg9[%c0_19, %c0_20, %c0_21] : memref<1x1x8xf32, #tpu.memory_space<vmem>>, vector<1x1x8xf32>
    %21 = vector.shape_cast %20 : vector<1x1x8xf32> to vector<1x8xf32>
    %22 = vector.broadcast %21 : vector<1x8xf32> to vector<8x8xf32>
    %23 = arith.addf %19, %22 : vector<8x8xf32>
    %24 = arith.truncf %9 : vector<8x8xf32> to vector<8x8xbf16>
    %c0_22 = arith.constant 0 : index
    %c0_23 = arith.constant 0 : index
    %c0_24 = arith.constant 0 : index
    %c0_25 = arith.constant 0 : index
    %25 = vector.load %arg10[%c0_22, %c0_23, %c0_24, %c0_25] : memref<1x1x8x8xbf16, #tpu.memory_space<vmem>>, vector<1x1x8x8xbf16>
    %26 = vector.shape_cast %25 : vector<1x1x8x8xbf16> to vector<8x8xbf16>
    %27 = vector.shape_cast %24 : vector<8x8xbf16> to vector<1x1x8x8xbf16>
    tpu.vector_store %arg10[%c0_22, %c0_23, %c0_24, %c0_25], %27 {strides = array<i32>} : memref<1x1x8x8xbf16, #tpu.memory_space<vmem>>, vector<1x1x8x8xbf16>,
    %28 = arith.truncf %16 : vector<8x8xf32> to vector<8x8xbf16>
    %c0_26 = arith.constant 0 : index
    %c0_27 = arith.constant 0 : index
    %c0_28 = arith.constant 0 : index
    %c0_29 = arith.constant 0 : index
    %29 = vector.load %arg11[%c0_26, %c0_27, %c0_28, %c0_29] : memref<1x1x8x8xbf16, #tpu.memory_space<vmem>>, vector<1x1x8x8xbf16>
    %30 = vector.shape_cast %29 : vector<1x1x8x8xbf16> to vector<8x8xbf16>
    %31 = vector.shape_cast %28 : vector<8x8xbf16> to vector<1x1x8x8xbf16>
    tpu.vector_store %arg11[%c0_26, %c0_27, %c0_28, %c0_29], %31 {strides = array<i32>} : memref<1x1x8x8xbf16, #tpu.memory_space<vmem>>, vector<1x1x8x8xbf16>,
    %32 = arith.truncf %23 : vector<8x8xf32> to vector<8x8xbf16>
    %c0_30 = arith.constant 0 : index
    %c0_31 = arith.constant 0 : index
    %c0_32 = arith.constant 0 : index
    %c0_33 = arith.constant 0 : index
    %33 = vector.load %arg12[%c0_30, %c0_31, %c0_32, %c0_33] : memref<1x1x8x8xbf16, #tpu.memory_space<vmem>>, vector<1x1x8x8xbf16>
    %34 = vector.shape_cast %33 : vector<1x1x8x8xbf16> to vector<8x8xbf16>
    %35 = vector.shape_cast %32 : vector<8x8xbf16> to vector<1x1x8x8xbf16>
    tpu.vector_store %arg12[%c0_30, %c0_31, %c0_32, %c0_33], %35 {strides = array<i32>} : memref<1x1x8x8xbf16, #tpu.memory_space<vmem>>, vector<1x1x8x8xbf16>,
    return
  }
  func.func @transform_0(%arg0: i32, %arg1: i32, %arg2: i32) -> (i32, i32, i32) {
    %c0_i32 = arith.constant 0 : i32
    %c0_i32_0 = arith.constant 0 : i32
    return %arg0, %arg1, %c0_i32 : i32, i32, i32
  }
  func.func @transform_1(%arg0: i32, %arg1: i32, %arg2: i32) -> (i32, i32, i32) {
    %c0_i32 = arith.constant 0 : i32
    %c0_i32_0 = arith.constant 0 : i32
    %c0_i32_1 = arith.constant 0 : i32
    return %arg2, %c0_i32, %c0_i32_0 : i32, i32, i32
  }
  func.func @transform_2(%arg0: i32, %arg1: i32, %arg2: i32) -> (i32, i32, i32) {
    %c0_i32 = arith.constant 0 : i32
    %c0_i32_0 = arith.constant 0 : i32
    %c0_i32_1 = arith.constant 0 : i32
    return %arg2, %c0_i32, %c0_i32_0 : i32, i32, i32
  }
  func.func @transform_3(%arg0: i32, %arg1: i32, %arg2: i32) -> (i32, i32, i32) {
    %c0_i32 = arith.constant 0 : i32
    %c0_i32_0 = arith.constant 0 : i32
    %c0_i32_1 = arith.constant 0 : i32
    return %arg2, %c0_i32, %c0_i32_0 : i32, i32, i32
  }
  func.func @transform_4(%arg0: i32, %arg1: i32, %arg2: i32) -> (i32, i32, i32) {
    %c0_i32 = arith.constant 0 : i32
    %c0_i32_0 = arith.constant 0 : i32
    %c0_i32_1 = arith.constant 0 : i32
    return %arg2, %c0_i32, %c0_i32_0 : i32, i32, i32
  }
  func.func @transform_5(%arg0: i32, %arg1: i32, %arg2: i32) -> (i32, i32, i32) {
    %c0_i32 = arith.constant 0 : i32
    %c0_i32_0 = arith.constant 0 : i32
    %c0_i32_1 = arith.constant 0 : i32
    return %arg2, %c0_i32, %c0_i32_0 : i32, i32, i32
  }
  func.func @transform_6(%arg0: i32, %arg1: i32, %arg2: i32) -> (i32, i32, i32) {
    %c0_i32 = arith.constant 0 : i32
    %c0_i32_0 = arith.constant 0 : i32
    %c0_i32_1 = arith.constant 0 : i32
    return %arg2, %c0_i32, %c0_i32_0 : i32, i32, i32
  }
  func.func @transform_7(%arg0: i32, %arg1: i32, %arg2: i32) -> (i32, i32, i32, i32) {
    %c0_i32 = arith.constant 0 : i32
    %c0_i32_0 = arith.constant 0 : i32
    return %arg0, %arg2, %arg1, %c0_i32 : i32, i32, i32, i32
  }
  func.func @transform_8(%arg0: i32, %arg1: i32, %arg2: i32) -> (i32, i32, i32, i32) {
    %c0_i32 = arith.constant 0 : i32
    %c0_i32_0 = arith.constant 0 : i32
    return %arg0, %arg2, %arg1, %c0_i32 : i32, i32, i32, i32
  }
  func.func @transform_9(%arg0: i32, %arg1: i32, %arg2: i32) -> (i32, i32, i32, i32) {
    %c0_i32 = arith.constant 0 : i32
    %c0_i32_0 = arith.constant 0 : i32
    return %arg0, %arg2, %arg1, %c0_i32 : i32, i32, i32, i32
  }
}

module attributes {stable_mosaic.version = 11 : i64} {
  func.func @flash_attn_kernel(%arg0: i32, %arg1: i32, %arg2: i32, %arg3: i32, %arg4: memref<1x1x8x8xbf16, #tpu.memory_space<vmem>>, %arg5: memref<1x1x8x8xbf16, #tpu.memory_space<vmem>>, %arg6: memref<1x1x8x8xbf16, #tpu.memory_space<vmem>>, %arg7: memref<1x1x8x8xbf16, #tpu.memory_space<vmem>>, %arg8: memref<8x1xf32, #tpu.memory_space<vmem>>, %arg9: memref<8x1xf32, #tpu.memory_space<vmem>>, %arg10: memref<8x8xf32, #tpu.memory_space<vmem>>) attributes {dimension_semantics = [#tpu.dimension_semantics<parallel>, #tpu.dimension_semantics<parallel>, #tpu.dimension_semantics<parallel>, #tpu.dimension_semantics<arbitrary>], iteration_bounds = array<i64: 2, 4, 1, 1>, scalar_prefetch = 0 : i64, scratch_operands = 3 : i64, tpu.core_type = #tpu.core_type<tc>, window_params = [{transform_indices = @transform_0, window_bounds = array<i64: 1, 1, 8, 8>}, {transform_indices = @transform_1, window_bounds = array<i64: 1, 1, 8, 8>}, {transform_indices = @transform_2, window_bounds = array<i64: 1, 1, 8, 8>}, {transform_indices = @transform_3, window_bounds = array<i64: 1, 1, 8, 8>}]} {
    %c0_i32 = arith.constant 0 : i32
    %0 = arith.cmpi eq, %arg3, %c0_i32 : i32
    %1 = arith.extui %0 : i1 to i32
    %c0_i32_0 = arith.constant 0 : i32
    %2 = arith.cmpi ne, %1, %c0_i32_0 : i32
    scf.if %2 {
      %cst_29 = arith.constant 0xFF800000 : f32
      %36 = vector.broadcast %cst_29 : f32 to vector<8x1xf32>
      %c0_30 = arith.constant 0 : index
      %c0_31 = arith.constant 0 : index
      %37 = vector.load %arg8[%c0_30, %c0_31] : memref<8x1xf32, #tpu.memory_space<vmem>>, vector<8x1xf32>
      tpu.vector_store %arg8[%c0_30, %c0_31], %36 {strides = array<i32>} : memref<8x1xf32, #tpu.memory_space<vmem>>, vector<8x1xf32>,
      %cst_32 = arith.constant 0.000000e+00 : f32
      %38 = vector.broadcast %cst_32 : f32 to vector<8x1xf32>
      %c0_33 = arith.constant 0 : index
      %c0_34 = arith.constant 0 : index
      %39 = vector.load %arg9[%c0_33, %c0_34] : memref<8x1xf32, #tpu.memory_space<vmem>>, vector<8x1xf32>
      tpu.vector_store %arg9[%c0_33, %c0_34], %38 {strides = array<i32>} : memref<8x1xf32, #tpu.memory_space<vmem>>, vector<8x1xf32>,
      %cst_35 = arith.constant 0.000000e+00 : f32
      %40 = vector.broadcast %cst_35 : f32 to vector<8x8xf32>
      %c0_36 = arith.constant 0 : index
      %c0_37 = arith.constant 0 : index
      %41 = vector.load %arg10[%c0_36, %c0_37] : memref<8x8xf32, #tpu.memory_space<vmem>>, vector<8x8xf32>
      tpu.vector_store %arg10[%c0_36, %c0_37], %40 {strides = array<i32>} : memref<8x8xf32, #tpu.memory_space<vmem>>, vector<8x8xf32>,
    } else {
    }
    %c0 = arith.constant 0 : index
    %c0_1 = arith.constant 0 : index
    %c0_2 = arith.constant 0 : index
    %c0_3 = arith.constant 0 : index
    %3 = vector.load %arg4[%c0, %c0_1, %c0_2, %c0_3] : memref<1x1x8x8xbf16, #tpu.memory_space<vmem>>, vector<1x1x8x8xbf16>
    %4 = vector.shape_cast %3 : vector<1x1x8x8xbf16> to vector<8x8xbf16>
    %c0_4 = arith.constant 0 : index
    %c0_5 = arith.constant 0 : index
    %c0_6 = arith.constant 0 : index
    %c0_7 = arith.constant 0 : index
    %5 = vector.load %arg5[%c0_4, %c0_5, %c0_6, %c0_7] : memref<1x1x8x8xbf16, #tpu.memory_space<vmem>>, vector<1x1x8x8xbf16>
    %6 = vector.shape_cast %5 : vector<1x1x8x8xbf16> to vector<8x8xbf16>
    %c0_8 = arith.constant 0 : index
    %c0_9 = arith.constant 0 : index
    %c0_10 = arith.constant 0 : index
    %c0_11 = arith.constant 0 : index
    %7 = vector.load %arg6[%c0_8, %c0_9, %c0_10, %c0_11] : memref<1x1x8x8xbf16, #tpu.memory_space<vmem>>, vector<1x1x8x8xbf16>
    %8 = vector.shape_cast %7 : vector<1x1x8x8xbf16> to vector<8x8xbf16>
    %cst = arith.constant dense<0.000000e+00> : vector<8x8xf32>
    %9 = tpu.matmul %4, %6, %cst {dimension_numbers = #tpu.dot_dimension_numbers<[1], [1], [0], [0], [0, 0, 1, 0], [], []>} : vector<8x8xbf16>, vector<8x8xbf16>, vector<8x8xf32> -> vector<8x8xf32>
    %c0_12 = arith.constant 0 : index
    %c0_13 = arith.constant 0 : index
    %10 = vector.load %arg8[%c0_12, %c0_13] : memref<8x1xf32, #tpu.memory_space<vmem>>, vector<8x1xf32>
    %cst_14 = arith.constant dense<0xFF800000> : vector<8xf32>
    %11 = vector.multi_reduction <maximumf>, %9, %cst_14 [1] : vector<8x8xf32> to vector<8xf32>
    %12 = vector.shape_cast %11 : vector<8xf32> to vector<8x1xf32>
    %13 = arith.maximumf %10, %12 : vector<8x1xf32>
    %14 = arith.subf %10, %13 : vector<8x1xf32>
    %15 = math.exp %14 : vector<8x1xf32>
    %16 = vector.broadcast %13 : vector<8x1xf32> to vector<8x8xf32>
    %17 = arith.subf %9, %16 : vector<8x8xf32>
    %18 = math.exp %17 : vector<8x8xf32>
    %c0_15 = arith.constant 0 : index
    %c0_16 = arith.constant 0 : index
    %19 = vector.load %arg9[%c0_15, %c0_16] : memref<8x1xf32, #tpu.memory_space<vmem>>, vector<8x1xf32>
    %20 = arith.mulf %15, %19 : vector<8x1xf32>
    %cst_17 = arith.constant dense<0.000000e+00> : vector<8xf32>
    %21 = vector.multi_reduction <add>, %18, %cst_17 [1] : vector<8x8xf32> to vector<8xf32>
    %22 = vector.shape_cast %21 : vector<8xf32> to vector<8x1xf32>
    %23 = arith.addf %20, %22 : vector<8x1xf32>
    %c0_18 = arith.constant 0 : index
    %c0_19 = arith.constant 0 : index
    %24 = vector.load %arg9[%c0_18, %c0_19] : memref<8x1xf32, #tpu.memory_space<vmem>>, vector<8x1xf32>
    tpu.vector_store %arg9[%c0_18, %c0_19], %23 {strides = array<i32>} : memref<8x1xf32, #tpu.memory_space<vmem>>, vector<8x1xf32>,
    %c0_20 = arith.constant 0 : index
    %c0_21 = arith.constant 0 : index
    %25 = vector.load %arg10[%c0_20, %c0_21] : memref<8x8xf32, #tpu.memory_space<vmem>>, vector<8x8xf32>
    %26 = vector.broadcast %15 : vector<8x1xf32> to vector<8x8xf32>
    %27 = arith.mulf %26, %25 : vector<8x8xf32>
    %28 = arith.truncf %18 : vector<8x8xf32> to vector<8x8xbf16>
    %cst_22 = arith.constant dense<0.000000e+00> : vector<8x8xf32>
    %29 = tpu.matmul %28, %8, %cst_22 {dimension_numbers = #tpu.dot_dimension_numbers<[1], [0], [0], [1], [0, 0, 1, 1], [], []>} : vector<8x8xbf16>, vector<8x8xbf16>, vector<8x8xf32> -> vector<8x8xf32>
    %30 = arith.addf %27, %29 : vector<8x8xf32>
    %c0_23 = arith.constant 0 : index
    %c0_24 = arith.constant 0 : index
    %31 = vector.load %arg10[%c0_23, %c0_24] : memref<8x8xf32, #tpu.memory_space<vmem>>, vector<8x8xf32>
    tpu.vector_store %arg10[%c0_23, %c0_24], %30 {strides = array<i32>} : memref<8x8xf32, #tpu.memory_space<vmem>>, vector<8x8xf32>,
    %c0_25 = arith.constant 0 : index
    %c0_26 = arith.constant 0 : index
    %32 = vector.load %arg8[%c0_25, %c0_26] : memref<8x1xf32, #tpu.memory_space<vmem>>, vector<8x1xf32>
    tpu.vector_store %arg8[%c0_25, %c0_26], %13 {strides = array<i32>} : memref<8x1xf32, #tpu.memory_space<vmem>>, vector<8x1xf32>,
    %c0_i32_27 = arith.constant 0 : i32
    %33 = arith.cmpi eq, %arg3, %c0_i32_27 : i32
    %34 = arith.extui %33 : i1 to i32
    %c0_i32_28 = arith.constant 0 : i32
    %35 = arith.cmpi ne, %34, %c0_i32_28 : i32
    scf.if %35 {
      %c0_29 = arith.constant 0 : index
      %c0_30 = arith.constant 0 : index
      %36 = vector.load %arg9[%c0_29, %c0_30] : memref<8x1xf32, #tpu.memory_space<vmem>>, vector<8x1xf32>
      %37 = tpu.reciprocal %36 {approx = true} : vector<8x1xf32> -> vector<8x1xf32>
      %c0_31 = arith.constant 0 : index
      %c0_32 = arith.constant 0 : index
      %38 = vector.load %arg10[%c0_31, %c0_32] : memref<8x8xf32, #tpu.memory_space<vmem>>, vector<8x8xf32>
      %39 = vector.broadcast %37 : vector<8x1xf32> to vector<8x8xf32>
      %40 = arith.mulf %38, %39 : vector<8x8xf32>
      %41 = arith.truncf %40 : vector<8x8xf32> to vector<8x8xbf16>
      %c0_33 = arith.constant 0 : index
      %c0_34 = arith.constant 0 : index
      %c0_35 = arith.constant 0 : index
      %c0_36 = arith.constant 0 : index
      %42 = vector.load %arg7[%c0_33, %c0_34, %c0_35, %c0_36] : memref<1x1x8x8xbf16, #tpu.memory_space<vmem>>, vector<1x1x8x8xbf16>
      %43 = vector.shape_cast %42 : vector<1x1x8x8xbf16> to vector<8x8xbf16>
      %44 = vector.shape_cast %41 : vector<8x8xbf16> to vector<1x1x8x8xbf16>
      tpu.vector_store %arg7[%c0_33, %c0_34, %c0_35, %c0_36], %44 {strides = array<i32>} : memref<1x1x8x8xbf16, #tpu.memory_space<vmem>>, vector<1x1x8x8xbf16>,
    } else {
    }
    return
  }
  func.func @transform_0(%arg0: i32, %arg1: i32, %arg2: i32, %arg3: i32) -> (i32, i32, i32, i32) {
    %c0_i32 = arith.constant 0 : i32
    %c0_i32_0 = arith.constant 0 : i32
    return %arg0, %arg1, %arg2, %c0_i32 : i32, i32, i32, i32
  }
  func.func @transform_1(%arg0: i32, %arg1: i32, %arg2: i32, %arg3: i32) -> (i32, i32, i32, i32) {
    %c0_i32 = arith.constant 0 : i32
    %c0_i32_0 = arith.constant 0 : i32
    return %arg0, %arg1, %arg3, %c0_i32 : i32, i32, i32, i32
  }
  func.func @transform_2(%arg0: i32, %arg1: i32, %arg2: i32, %arg3: i32) -> (i32, i32, i32, i32) {
    %c0_i32 = arith.constant 0 : i32
    %c0_i32_0 = arith.constant 0 : i32
    return %arg0, %arg1, %arg3, %c0_i32 : i32, i32, i32, i32
  }
  func.func @transform_3(%arg0: i32, %arg1: i32, %arg2: i32, %arg3: i32) -> (i32, i32, i32, i32) {
    %c0_i32 = arith.constant 0 : i32
    %c0_i32_0 = arith.constant 0 : i32
    return %arg0, %arg1, %arg2, %c0_i32 : i32, i32, i32, i32
  }
}

module attributes {stable_mosaic.version = 11 : i64} {
  func.func @attn_out_ln_kernel(%arg0: i32, %arg1: i32, %arg2: i32, %arg3: memref<1x8x32xf32, #tpu.memory_space<vmem>>, %arg4: memref<1x4x8x8xbf16, #tpu.memory_space<vmem>>, %arg5: memref<4x8x32xbf16, #tpu.memory_space<vmem>>, %arg6: memref<1x32xf32, #tpu.memory_space<vmem>>, %arg7: memref<1x32xf32, #tpu.memory_space<vmem>>, %arg8: memref<1x32xf32, #tpu.memory_space<vmem>>, %arg9: memref<1x8x32xf32, #tpu.memory_space<vmem>>, %arg10: memref<8x32xf32, #tpu.memory_space<vmem>>) attributes {dimension_semantics = [#tpu.dimension_semantics<parallel>, #tpu.dimension_semantics<parallel>, #tpu.dimension_semantics<arbitrary>], iteration_bounds = array<i64: 2, 1, 1>, scalar_prefetch = 0 : i64, scratch_operands = 1 : i64, tpu.core_type = #tpu.core_type<tc>, window_params = [{transform_indices = @transform_0, window_bounds = array<i64: 1, 8, 32>}, {transform_indices = @transform_1, window_bounds = array<i64: 1, 4, 8, 8>}, {transform_indices = @transform_2, window_bounds = array<i64: 4, 8, 32>}, {pipeline_mode = #tpu.pipeline_mode<synchronous>, transform_indices = @transform_3, window_bounds = array<i64: 1, 32>}, {pipeline_mode = #tpu.pipeline_mode<synchronous>, transform_indices = @transform_4, window_bounds = array<i64: 1, 32>}, {pipeline_mode = #tpu.pipeline_mode<synchronous>, transform_indices = @transform_5, window_bounds = array<i64: 1, 32>}, {transform_indices = @transform_6, window_bounds = array<i64: 1, 8, 32>}]} {
    %c0_i32 = arith.constant 0 : i32
    %0 = arith.cmpi eq, %arg2, %c0_i32 : i32
    %1 = arith.extui %0 : i1 to i32
    %c0_i32_0 = arith.constant 0 : i32
    %2 = arith.cmpi ne, %1, %c0_i32_0 : i32
    scf.if %2 {
      %cst_34 = arith.constant 0.000000e+00 : f32
      %32 = vector.broadcast %cst_34 : f32 to vector<8x32xf32>
      %c0_35 = arith.constant 0 : index
      %c0_36 = arith.constant 0 : index
      %33 = vector.load %arg10[%c0_35, %c0_36] : memref<8x32xf32, #tpu.memory_space<vmem>>, vector<8x32xf32>
      tpu.vector_store %arg10[%c0_35, %c0_36], %32 {strides = array<i32>} : memref<8x32xf32, #tpu.memory_space<vmem>>, vector<8x32xf32>,
    } else {
    }
    %c0 = arith.constant 0 : index
    %c0_1 = arith.constant 0 : index
    %3 = vector.load %arg10[%c0, %c0_1] : memref<8x32xf32, #tpu.memory_space<vmem>>, vector<8x32xf32>
    %c0_2 = arith.constant 0 : index
    %c0_3 = arith.constant 0 : index
    %c0_4 = arith.constant 0 : index
    %c0_5 = arith.constant 0 : index
    %4 = vector.load %arg4[%c0_2, %c0_3, %c0_4, %c0_5] : memref<1x4x8x8xbf16, #tpu.memory_space<vmem>>, vector<1x1x8x8xbf16>
    %5 = vector.shape_cast %4 : vector<1x1x8x8xbf16> to vector<8x8xbf16>
    %c0_6 = arith.constant 0 : index
    %c0_7 = arith.constant 0 : index
    %c0_8 = arith.constant 0 : index
    %6 = vector.load %arg5[%c0_6, %c0_7, %c0_8] : memref<4x8x32xbf16, #tpu.memory_space<vmem>>, vector<1x8x32xbf16>
    %7 = vector.shape_cast %6 : vector<1x8x32xbf16> to vector<8x32xbf16>
    %cst = arith.constant dense<0.000000e+00> : vector<8x32xf32>
    %8 = tpu.matmul %5, %7, %cst {dimension_numbers = #tpu.dot_dimension_numbers<[1], [0], [0], [1], [0, 0, 1, 1], [], []>} : vector<8x8xbf16>, vector<8x32xbf16>, vector<8x32xf32> -> vector<8x32xf32>
    %9 = arith.addf %3, %8 : vector<8x32xf32>
    %c0_9 = arith.constant 0 : index
    %c1 = arith.constant 1 : index
    %c0_10 = arith.constant 0 : index
    %c0_11 = arith.constant 0 : index
    %10 = vector.load %arg4[%c0_9, %c1, %c0_10, %c0_11] : memref<1x4x8x8xbf16, #tpu.memory_space<vmem>>, vector<1x1x8x8xbf16>
    %11 = vector.shape_cast %10 : vector<1x1x8x8xbf16> to vector<8x8xbf16>
    %c1_12 = arith.constant 1 : index
    %c0_13 = arith.constant 0 : index
    %c0_14 = arith.constant 0 : index
    %12 = vector.load %arg5[%c1_12, %c0_13, %c0_14] : memref<4x8x32xbf16, #tpu.memory_space<vmem>>, vector<1x8x32xbf16>
    %13 = vector.shape_cast %12 : vector<1x8x32xbf16> to vector<8x32xbf16>
    %cst_15 = arith.constant dense<0.000000e+00> : vector<8x32xf32>
    %14 = tpu.matmul %11, %13, %cst_15 {dimension_numbers = #tpu.dot_dimension_numbers<[1], [0], [0], [1], [0, 0, 1, 1], [], []>} : vector<8x8xbf16>, vector<8x32xbf16>, vector<8x32xf32> -> vector<8x32xf32>
    %15 = arith.addf %9, %14 : vector<8x32xf32>
    %c0_16 = arith.constant 0 : index
    %c2 = arith.constant 2 : index
    %c0_17 = arith.constant 0 : index
    %c0_18 = arith.constant 0 : index
    %16 = vector.load %arg4[%c0_16, %c2, %c0_17, %c0_18] : memref<1x4x8x8xbf16, #tpu.memory_space<vmem>>, vector<1x1x8x8xbf16>
    %17 = vector.shape_cast %16 : vector<1x1x8x8xbf16> to vector<8x8xbf16>
    %c2_19 = arith.constant 2 : index
    %c0_20 = arith.constant 0 : index
    %c0_21 = arith.constant 0 : index
    %18 = vector.load %arg5[%c2_19, %c0_20, %c0_21] : memref<4x8x32xbf16, #tpu.memory_space<vmem>>, vector<1x8x32xbf16>
    %19 = vector.shape_cast %18 : vector<1x8x32xbf16> to vector<8x32xbf16>
    %cst_22 = arith.constant dense<0.000000e+00> : vector<8x32xf32>
    %20 = tpu.matmul %17, %19, %cst_22 {dimension_numbers = #tpu.dot_dimension_numbers<[1], [0], [0], [1], [0, 0, 1, 1], [], []>} : vector<8x8xbf16>, vector<8x32xbf16>, vector<8x32xf32> -> vector<8x32xf32>
    %21 = arith.addf %15, %20 : vector<8x32xf32>
    %c0_23 = arith.constant 0 : index
    %c3 = arith.constant 3 : index
    %c0_24 = arith.constant 0 : index
    %c0_25 = arith.constant 0 : index
    %22 = vector.load %arg4[%c0_23, %c3, %c0_24, %c0_25] : memref<1x4x8x8xbf16, #tpu.memory_space<vmem>>, vector<1x1x8x8xbf16>
    %23 = vector.shape_cast %22 : vector<1x1x8x8xbf16> to vector<8x8xbf16>
    %c3_26 = arith.constant 3 : index
    %c0_27 = arith.constant 0 : index
    %c0_28 = arith.constant 0 : index
    %24 = vector.load %arg5[%c3_26, %c0_27, %c0_28] : memref<4x8x32xbf16, #tpu.memory_space<vmem>>, vector<1x8x32xbf16>
    %25 = vector.shape_cast %24 : vector<1x8x32xbf16> to vector<8x32xbf16>
    %cst_29 = arith.constant dense<0.000000e+00> : vector<8x32xf32>
    %26 = tpu.matmul %23, %25, %cst_29 {dimension_numbers = #tpu.dot_dimension_numbers<[1], [0], [0], [1], [0, 0, 1, 1], [], []>} : vector<8x8xbf16>, vector<8x32xbf16>, vector<8x32xf32> -> vector<8x32xf32>
    %27 = arith.addf %21, %26 : vector<8x32xf32>
    %c0_30 = arith.constant 0 : index
    %c0_31 = arith.constant 0 : index
    %28 = vector.load %arg10[%c0_30, %c0_31] : memref<8x32xf32, #tpu.memory_space<vmem>>, vector<8x32xf32>
    tpu.vector_store %arg10[%c0_30, %c0_31], %27 {strides = array<i32>} : memref<8x32xf32, #tpu.memory_space<vmem>>, vector<8x32xf32>,
    %c0_i32_32 = arith.constant 0 : i32
    %29 = arith.cmpi eq, %arg2, %c0_i32_32 : i32
    %30 = arith.extui %29 : i1 to i32
    %c0_i32_33 = arith.constant 0 : i32
    %31 = arith.cmpi ne, %30, %c0_i32_33 : i32
    scf.if %31 {
      %c0_34 = arith.constant 0 : index
      %c0_35 = arith.constant 0 : index
      %c0_36 = arith.constant 0 : index
      %32 = vector.load %arg3[%c0_34, %c0_35, %c0_36] : memref<1x8x32xf32, #tpu.memory_space<vmem>>, vector<1x8x32xf32>
      %33 = vector.shape_cast %32 : vector<1x8x32xf32> to vector<8x32xf32>
      %c0_37 = arith.constant 0 : index
      %c0_38 = arith.constant 0 : index
      %34 = vector.load %arg10[%c0_37, %c0_38] : memref<8x32xf32, #tpu.memory_space<vmem>>, vector<8x32xf32>
      %35 = arith.addf %33, %34 : vector<8x32xf32>
      %c0_39 = arith.constant 0 : index
      %c0_40 = arith.constant 0 : index
      %36 = vector.load %arg6[%c0_39, %c0_40] : memref<1x32xf32, #tpu.memory_space<vmem>>, vector<1x32xf32>
      %37 = vector.broadcast %36 : vector<1x32xf32> to vector<8x32xf32>
      %38 = arith.addf %35, %37 : vector<8x32xf32>
      %c0_41 = arith.constant 0 : index
      %c0_42 = arith.constant 0 : index
      %39 = vector.load %arg7[%c0_41, %c0_42] : memref<1x32xf32, #tpu.memory_space<vmem>>, vector<1x32xf32>
      %c0_43 = arith.constant 0 : index
      %c0_44 = arith.constant 0 : index
      %40 = vector.load %arg8[%c0_43, %c0_44] : memref<1x32xf32, #tpu.memory_space<vmem>>, vector<1x32xf32>
      %cst_45 = arith.constant dense<0.000000e+00> : vector<8xf32>
      %41 = vector.multi_reduction <add>, %38, %cst_45 [1] : vector<8x32xf32> to vector<8xf32>
      %42 = vector.shape_cast %41 : vector<8xf32> to vector<8x1xf32>
      %cst_46 = arith.constant 3.200000e+01 : f32
      %43 = vector.broadcast %cst_46 : f32 to vector<8x1xf32>
      %44 = arith.divf %42, %43 : vector<8x1xf32>
      %45 = vector.broadcast %44 : vector<8x1xf32> to vector<8x32xf32>
      %46 = arith.subf %38, %45 : vector<8x32xf32>
      %47 = arith.mulf %46, %46 : vector<8x32xf32>
      %cst_47 = arith.constant dense<0.000000e+00> : vector<8xf32>
      %48 = vector.multi_reduction <add>, %47, %cst_47 [1] : vector<8x32xf32> to vector<8xf32>
      %49 = vector.shape_cast %48 : vector<8xf32> to vector<8x1xf32>
      %cst_48 = arith.constant 3.200000e+01 : f32
      %50 = vector.broadcast %cst_48 : f32 to vector<8x1xf32>
      %51 = arith.divf %49, %50 : vector<8x1xf32>
      %52 = vector.broadcast %44 : vector<8x1xf32> to vector<8x32xf32>
      %53 = arith.subf %38, %52 : vector<8x32xf32>
      %cst_49 = arith.constant 9.99999974E-6 : f32
      %54 = vector.broadcast %cst_49 : f32 to vector<8x1xf32>
      %55 = arith.addf %51, %54 : vector<8x1xf32>
      %56 = math.rsqrt %55 : vector<8x1xf32>
      %57 = vector.broadcast %56 : vector<8x1xf32> to vector<8x32xf32>
      %58 = arith.mulf %53, %57 : vector<8x32xf32>
      %59 = vector.broadcast %39 : vector<1x32xf32> to vector<8x32xf32>
      %60 = arith.mulf %58, %59 : vector<8x32xf32>
      %61 = vector.broadcast %40 : vector<1x32xf32> to vector<8x32xf32>
      %62 = arith.addf %60, %61 : vector<8x32xf32>
      %c0_50 = arith.constant 0 : index
      %c0_51 = arith.constant 0 : index
      %c0_52 = arith.constant 0 : index
      %63 = vector.load %arg9[%c0_50, %c0_51, %c0_52] : memref<1x8x32xf32, #tpu.memory_space<vmem>>, vector<1x8x32xf32>
      %64 = vector.shape_cast %63 : vector<1x8x32xf32> to vector<8x32xf32>
      %65 = vector.shape_cast %62 : vector<8x32xf32> to vector<1x8x32xf32>
      tpu.vector_store %arg9[%c0_50, %c0_51, %c0_52], %65 {strides = array<i32>} : memref<1x8x32xf32, #tpu.memory_space<vmem>>, vector<1x8x32xf32>,
    } else {
    }
    return
  }
  func.func @transform_0(%arg0: i32, %arg1: i32, %arg2: i32) -> (i32, i32, i32) {
    %c0_i32 = arith.constant 0 : i32
    %c0_i32_0 = arith.constant 0 : i32
    return %arg0, %arg1, %c0_i32 : i32, i32, i32
  }
  func.func @transform_1(%arg0: i32, %arg1: i32, %arg2: i32) -> (i32, i32, i32, i32) {
    %c0_i32 = arith.constant 0 : i32
    %c0_i32_0 = arith.constant 0 : i32
    return %arg0, %arg2, %arg1, %c0_i32 : i32, i32, i32, i32
  }
  func.func @transform_2(%arg0: i32, %arg1: i32, %arg2: i32) -> (i32, i32, i32) {
    %c0_i32 = arith.constant 0 : i32
    %c0_i32_0 = arith.constant 0 : i32
    %c0_i32_1 = arith.constant 0 : i32
    return %arg2, %c0_i32, %c0_i32_0 : i32, i32, i32
  }
  func.func @transform_3(%arg0: i32, %arg1: i32, %arg2: i32) -> (i32, i32) {
    %c0_i32 = arith.constant 0 : i32
    %c0_i32_0 = arith.constant 0 : i32
    %c0_i32_1 = arith.constant 0 : i32
    return %c0_i32, %c0_i32_0 : i32, i32
  }
  func.func @transform_4(%arg0: i32, %arg1: i32, %arg2: i32) -> (i32, i32) {
    %c0_i32 = arith.constant 0 : i32
    %c0_i32_0 = arith.constant 0 : i32
    %c0_i32_1 = arith.constant 0 : i32
    return %c0_i32, %c0_i32_0 : i32, i32
  }
  func.func @transform_5(%arg0: i32, %arg1: i32, %arg2: i32) -> (i32, i32) {
    %c0_i32 = arith.constant 0 : i32
    %c0_i32_0 = arith.constant 0 : i32
    %c0_i32_1 = arith.constant 0 : i32
    return %c0_i32, %c0_i32_0 : i32, i32
  }
  func.func @transform_6(%arg0: i32, %arg1: i32, %arg2: i32) -> (i32, i32, i32) {
    %c0_i32 = arith.constant 0 : i32
    %c0_i32_0 = arith.constant 0 : i32
    return %arg0, %arg1, %c0_i32 : i32, i32, i32
  }
}

module attributes {stable_mosaic.version = 11 : i64} {
  func.func @out_proj_kernel(%arg0: i32, %arg1: i32, %arg2: i32, %arg3: memref<1x8x32xf32, #tpu.memory_space<vmem>>, %arg4: memref<32x128xbf16, #tpu.memory_space<vmem>>, %arg5: memref<1x128xf32, #tpu.memory_space<vmem>>, %arg6: memref<1x8x128xf32, #tpu.memory_space<vmem>>) attributes {dimension_semantics = [#tpu.dimension_semantics<parallel>, #tpu.dimension_semantics<parallel>, #tpu.dimension_semantics<parallel>], iteration_bounds = array<i64: 2, 1, 1>, scalar_prefetch = 0 : i64, scratch_operands = 0 : i64, tpu.core_type = #tpu.core_type<tc>, window_params = [{transform_indices = @transform_0, window_bounds = array<i64: 1, 8, 32>}, {transform_indices = @transform_1, window_bounds = array<i64: 32, 128>}, {transform_indices = @transform_2, window_bounds = array<i64: 1, 128>}, {transform_indices = @transform_3, window_bounds = array<i64: 1, 8, 128>}]} {
    %c0 = arith.constant 0 : index
    %c0_0 = arith.constant 0 : index
    %c0_1 = arith.constant 0 : index
    %0 = vector.load %arg3[%c0, %c0_0, %c0_1] : memref<1x8x32xf32, #tpu.memory_space<vmem>>, vector<1x8x32xf32>
    %1 = vector.shape_cast %0 : vector<1x8x32xf32> to vector<8x32xf32>
    %2 = arith.truncf %1 : vector<8x32xf32> to vector<8x32xbf16>
    %c0_2 = arith.constant 0 : index
    %c0_3 = arith.constant 0 : index
    %3 = vector.load %arg4[%c0_2, %c0_3] : memref<32x128xbf16, #tpu.memory_space<vmem>>, vector<32x128xbf16>
    %cst = arith.constant dense<0.000000e+00> : vector<8x128xf32>
    %4 = tpu.matmul %2, %3, %cst {dimension_numbers = #tpu.dot_dimension_numbers<[1], [0], [0], [1], [0, 0, 1, 1], [], []>} : vector<8x32xbf16>, vector<32x128xbf16>, vector<8x128xf32> -> vector<8x128xf32>
    %c0_4 = arith.constant 0 : index
    %c0_5 = arith.constant 0 : index
    %5 = vector.load %arg5[%c0_4, %c0_5] : memref<1x128xf32, #tpu.memory_space<vmem>>, vector<1x128xf32>
    %6 = vector.broadcast %5 : vector<1x128xf32> to vector<8x128xf32>
    %7 = arith.addf %4, %6 : vector<8x128xf32>
    %c0_6 = arith.constant 0 : index
    %c0_7 = arith.constant 0 : index
    %c0_8 = arith.constant 0 : index
    %8 = vector.load %arg6[%c0_6, %c0_7, %c0_8] : memref<1x8x128xf32, #tpu.memory_space<vmem>>, vector<1x8x128xf32>
    %9 = vector.shape_cast %8 : vector<1x8x128xf32> to vector<8x128xf32>
    %10 = vector.shape_cast %7 : vector<8x128xf32> to vector<1x8x128xf32>
    tpu.vector_store %arg6[%c0_6, %c0_7, %c0_8], %10 {strides = array<i32>} : memref<1x8x128xf32, #tpu.memory_space<vmem>>, vector<1x8x128xf32>,
    return
  }
  func.func @transform_0(%arg0: i32, %arg1: i32, %arg2: i32) -> (i32, i32, i32) {
    %c0_i32 = arith.constant 0 : i32
    %c0_i32_0 = arith.constant 0 : i32
    return %arg0, %arg1, %c0_i32 : i32, i32, i32
  }
  func.func @transform_1(%arg0: i32, %arg1: i32, %arg2: i32) -> (i32, i32) {
    %c0_i32 = arith.constant 0 : i32
    %c0_i32_0 = arith.constant 0 : i32
    return %c0_i32, %arg2 : i32, i32
  }
  func.func @transform_2(%arg0: i32, %arg1: i32, %arg2: i32) -> (i32, i32) {
    %c0_i32 = arith.constant 0 : i32
    %c0_i32_0 = arith.constant 0 : i32
    return %c0_i32, %arg2 : i32, i32
  }
  func.func @transform_3(%arg0: i32, %arg1: i32, %arg2: i32) -> (i32, i32, i32) {
    %c0_i32 = arith.constant 0 : i32
    return %arg0, %arg1, %arg2 : i32, i32, i32
  }
}

module attributes {stable_mosaic.version = 11 : i64} {
  func.func @ffn_ln_kernel(%arg0: i32, %arg1: i32, %arg2: i32, %arg3: memref<1x8x32xf32, #tpu.memory_space<vmem>>, %arg4: memref<32x64xbf16, #tpu.memory_space<vmem>>, %arg5: memref<1x64xf32, #tpu.memory_space<vmem>>, %arg6: memref<64x32xbf16, #tpu.memory_space<vmem>>, %arg7: memref<1x32xf32, #tpu.memory_space<vmem>>, %arg8: memref<1x32xf32, #tpu.memory_space<vmem>>, %arg9: memref<1x32xf32, #tpu.memory_space<vmem>>, %arg10: memref<1x8x32xf32, #tpu.memory_space<vmem>>, %arg11: memref<8x32xf32, #tpu.memory_space<vmem>>) attributes {dimension_semantics = [#tpu.dimension_semantics<parallel>, #tpu.dimension_semantics<parallel>, #tpu.dimension_semantics<arbitrary>], iteration_bounds = array<i64: 2, 1, 1>, scalar_prefetch = 0 : i64, scratch_operands = 1 : i64, tpu.core_type = #tpu.core_type<tc>, window_params = [{transform_indices = @transform_0, window_bounds = array<i64: 1, 8, 32>}, {transform_indices = @transform_1, window_bounds = array<i64: 32, 64>}, {transform_indices = @transform_2, window_bounds = array<i64: 1, 64>}, {transform_indices = @transform_3, window_bounds = array<i64: 64, 32>}, {pipeline_mode = #tpu.pipeline_mode<synchronous>, transform_indices = @transform_4, window_bounds = array<i64: 1, 32>}, {pipeline_mode = #tpu.pipeline_mode<synchronous>, transform_indices = @transform_5, window_bounds = array<i64: 1, 32>}, {pipeline_mode = #tpu.pipeline_mode<synchronous>, transform_indices = @transform_6, window_bounds = array<i64: 1, 32>}, {transform_indices = @transform_7, window_bounds = array<i64: 1, 8, 32>}]} {
    %c0_i32 = arith.constant 0 : i32
    %0 = arith.cmpi eq, %arg2, %c0_i32 : i32
    %1 = arith.extui %0 : i1 to i32
    %c0_i32_0 = arith.constant 0 : i32
    %2 = arith.cmpi ne, %1, %c0_i32_0 : i32
    scf.if %2 {
      %cst_17 = arith.constant 0.000000e+00 : f32
      %22 = vector.broadcast %cst_17 : f32 to vector<8x32xf32>
      %c0_18 = arith.constant 0 : index
      %c0_19 = arith.constant 0 : index
      %23 = vector.load %arg11[%c0_18, %c0_19] : memref<8x32xf32, #tpu.memory_space<vmem>>, vector<8x32xf32>
      tpu.vector_store %arg11[%c0_18, %c0_19], %22 {strides = array<i32>} : memref<8x32xf32, #tpu.memory_space<vmem>>, vector<8x32xf32>,
    } else {
    }
    %c0 = arith.constant 0 : index
    %c0_1 = arith.constant 0 : index
    %c0_2 = arith.constant 0 : index
    %3 = vector.load %arg3[%c0, %c0_1, %c0_2] : memref<1x8x32xf32, #tpu.memory_space<vmem>>, vector<1x8x32xf32>
    %4 = vector.shape_cast %3 : vector<1x8x32xf32> to vector<8x32xf32>
    %5 = arith.truncf %4 : vector<8x32xf32> to vector<8x32xbf16>
    %c0_3 = arith.constant 0 : index
    %c0_4 = arith.constant 0 : index
    %6 = vector.load %arg4[%c0_3, %c0_4] : memref<32x64xbf16, #tpu.memory_space<vmem>>, vector<32x64xbf16>
    %cst = arith.constant dense<0.000000e+00> : vector<8x64xf32>
    %7 = tpu.matmul %5, %6, %cst {dimension_numbers = #tpu.dot_dimension_numbers<[1], [0], [0], [1], [0, 0, 1, 1], [], []>} : vector<8x32xbf16>, vector<32x64xbf16>, vector<8x64xf32> -> vector<8x64xf32>
    %c0_5 = arith.constant 0 : index
    %c0_6 = arith.constant 0 : index
    %8 = vector.load %arg5[%c0_5, %c0_6] : memref<1x64xf32, #tpu.memory_space<vmem>>, vector<1x64xf32>
    %9 = vector.broadcast %8 : vector<1x64xf32> to vector<8x64xf32>
    %10 = arith.addf %7, %9 : vector<8x64xf32>
    %cst_7 = arith.constant 0.000000e+00 : f32
    %11 = vector.broadcast %cst_7 : f32 to vector<8x64xf32>
    %12 = arith.maximumf %10, %11 : vector<8x64xf32>
    %c0_8 = arith.constant 0 : index
    %c0_9 = arith.constant 0 : index
    %13 = vector.load %arg11[%c0_8, %c0_9] : memref<8x32xf32, #tpu.memory_space<vmem>>, vector<8x32xf32>
    %14 = arith.truncf %12 : vector<8x64xf32> to vector<8x64xbf16>
    %c0_10 = arith.constant 0 : index
    %c0_11 = arith.constant 0 : index
    %15 = vector.load %arg6[%c0_10, %c0_11] : memref<64x32xbf16, #tpu.memory_space<vmem>>, vector<64x32xbf16>
    %cst_12 = arith.constant dense<0.000000e+00> : vector<8x32xf32>
    %16 = tpu.matmul %14, %15, %cst_12 {dimension_numbers = #tpu.dot_dimension_numbers<[1], [0], [0], [1], [0, 0, 1, 1], [], []>} : vector<8x64xbf16>, vector<64x32xbf16>, vector<8x32xf32> -> vector<8x32xf32>
    %17 = arith.addf %13, %16 : vector<8x32xf32>
    %c0_13 = arith.constant 0 : index
    %c0_14 = arith.constant 0 : index
    %18 = vector.load %arg11[%c0_13, %c0_14] : memref<8x32xf32, #tpu.memory_space<vmem>>, vector<8x32xf32>
    tpu.vector_store %arg11[%c0_13, %c0_14], %17 {strides = array<i32>} : memref<8x32xf32, #tpu.memory_space<vmem>>, vector<8x32xf32>,
    %c0_i32_15 = arith.constant 0 : i32
    %19 = arith.cmpi eq, %arg2, %c0_i32_15 : i32
    %20 = arith.extui %19 : i1 to i32
    %c0_i32_16 = arith.constant 0 : i32
    %21 = arith.cmpi ne, %20, %c0_i32_16 : i32
    scf.if %21 {
      %c0_17 = arith.constant 0 : index
      %c0_18 = arith.constant 0 : index
      %c0_19 = arith.constant 0 : index
      %22 = vector.load %arg3[%c0_17, %c0_18, %c0_19] : memref<1x8x32xf32, #tpu.memory_space<vmem>>, vector<1x8x32xf32>
      %23 = vector.shape_cast %22 : vector<1x8x32xf32> to vector<8x32xf32>
      %c0_20 = arith.constant 0 : index
      %c0_21 = arith.constant 0 : index
      %24 = vector.load %arg11[%c0_20, %c0_21] : memref<8x32xf32, #tpu.memory_space<vmem>>, vector<8x32xf32>
      %25 = arith.addf %23, %24 : vector<8x32xf32>
      %c0_22 = arith.constant 0 : index
      %c0_23 = arith.constant 0 : index
      %26 = vector.load %arg7[%c0_22, %c0_23] : memref<1x32xf32, #tpu.memory_space<vmem>>, vector<1x32xf32>
      %27 = vector.broadcast %26 : vector<1x32xf32> to vector<8x32xf32>
      %28 = arith.addf %25, %27 : vector<8x32xf32>
      %c0_24 = arith.constant 0 : index
      %c0_25 = arith.constant 0 : index
      %29 = vector.load %arg8[%c0_24, %c0_25] : memref<1x32xf32, #tpu.memory_space<vmem>>, vector<1x32xf32>
      %c0_26 = arith.constant 0 : index
      %c0_27 = arith.constant 0 : index
      %30 = vector.load %arg9[%c0_26, %c0_27] : memref<1x32xf32, #tpu.memory_space<vmem>>, vector<1x32xf32>
      %cst_28 = arith.constant dense<0.000000e+00> : vector<8xf32>
      %31 = vector.multi_reduction <add>, %28, %cst_28 [1] : vector<8x32xf32> to vector<8xf32>
      %32 = vector.shape_cast %31 : vector<8xf32> to vector<8x1xf32>
      %cst_29 = arith.constant 3.200000e+01 : f32
      %33 = vector.broadcast %cst_29 : f32 to vector<8x1xf32>
      %34 = arith.divf %32, %33 : vector<8x1xf32>
      %35 = vector.broadcast %34 : vector<8x1xf32> to vector<8x32xf32>
      %36 = arith.subf %28, %35 : vector<8x32xf32>
      %37 = arith.mulf %36, %36 : vector<8x32xf32>
      %cst_30 = arith.constant dense<0.000000e+00> : vector<8xf32>
      %38 = vector.multi_reduction <add>, %37, %cst_30 [1] : vector<8x32xf32> to vector<8xf32>
      %39 = vector.shape_cast %38 : vector<8xf32> to vector<8x1xf32>
      %cst_31 = arith.constant 3.200000e+01 : f32
      %40 = vector.broadcast %cst_31 : f32 to vector<8x1xf32>
      %41 = arith.divf %39, %40 : vector<8x1xf32>
      %42 = vector.broadcast %34 : vector<8x1xf32> to vector<8x32xf32>
      %43 = arith.subf %28, %42 : vector<8x32xf32>
      %cst_32 = arith.constant 9.99999974E-6 : f32
      %44 = vector.broadcast %cst_32 : f32 to vector<8x1xf32>
      %45 = arith.addf %41, %44 : vector<8x1xf32>
      %46 = math.rsqrt %45 : vector<8x1xf32>
      %47 = vector.broadcast %46 : vector<8x1xf32> to vector<8x32xf32>
      %48 = arith.mulf %43, %47 : vector<8x32xf32>
      %49 = vector.broadcast %29 : vector<1x32xf32> to vector<8x32xf32>
      %50 = arith.mulf %48, %49 : vector<8x32xf32>
      %51 = vector.broadcast %30 : vector<1x32xf32> to vector<8x32xf32>
      %52 = arith.addf %50, %51 : vector<8x32xf32>
      %c0_33 = arith.constant 0 : index
      %c0_34 = arith.constant 0 : index
      %c0_35 = arith.constant 0 : index
      %53 = vector.load %arg10[%c0_33, %c0_34, %c0_35] : memref<1x8x32xf32, #tpu.memory_space<vmem>>, vector<1x8x32xf32>
      %54 = vector.shape_cast %53 : vector<1x8x32xf32> to vector<8x32xf32>
      %55 = vector.shape_cast %52 : vector<8x32xf32> to vector<1x8x32xf32>
      tpu.vector_store %arg10[%c0_33, %c0_34, %c0_35], %55 {strides = array<i32>} : memref<1x8x32xf32, #tpu.memory_space<vmem>>, vector<1x8x32xf32>,
    } else {
    }
    return
  }
  func.func @transform_0(%arg0: i32, %arg1: i32, %arg2: i32) -> (i32, i32, i32) {
    %c0_i32 = arith.constant 0 : i32
    %c0_i32_0 = arith.constant 0 : i32
    return %arg0, %arg1, %c0_i32 : i32, i32, i32
  }
  func.func @transform_1(%arg0: i32, %arg1: i32, %arg2: i32) -> (i32, i32) {
    %c0_i32 = arith.constant 0 : i32
    %c0_i32_0 = arith.constant 0 : i32
    return %c0_i32, %arg2 : i32, i32
  }
  func.func @transform_2(%arg0: i32, %arg1: i32, %arg2: i32) -> (i32, i32) {
    %c0_i32 = arith.constant 0 : i32
    %c0_i32_0 = arith.constant 0 : i32
    return %c0_i32, %arg2 : i32, i32
  }
  func.func @transform_3(%arg0: i32, %arg1: i32, %arg2: i32) -> (i32, i32) {
    %c0_i32 = arith.constant 0 : i32
    %c0_i32_0 = arith.constant 0 : i32
    return %arg2, %c0_i32 : i32, i32
  }
  func.func @transform_4(%arg0: i32, %arg1: i32, %arg2: i32) -> (i32, i32) {
    %c0_i32 = arith.constant 0 : i32
    %c0_i32_0 = arith.constant 0 : i32
    %c0_i32_1 = arith.constant 0 : i32
    return %c0_i32, %c0_i32_0 : i32, i32
  }
  func.func @transform_5(%arg0: i32, %arg1: i32, %arg2: i32) -> (i32, i32) {
    %c0_i32 = arith.constant 0 : i32
    %c0_i32_0 = arith.constant 0 : i32
    %c0_i32_1 = arith.constant 0 : i32
    return %c0_i32, %c0_i32_0 : i32, i32
  }
  func.func @transform_6(%arg0: i32, %arg1: i32, %arg2: i32) -> (i32, i32) {
    %c0_i32 = arith.constant 0 : i32
    %c0_i32_0 = arith.constant 0 : i32
    %c0_i32_1 = arith.constant 0 : i32
    return %c0_i32, %c0_i32_0 : i32, i32
  }
  func.func @transform_7(%arg0: i32, %arg1: i32, %arg2: i32) -> (i32, i32, i32) {
    %c0_i32 = arith.constant 0 : i32
    %c0_i32_0 = arith.constant 0 : i32
    return %arg0, %arg1, %c0_i32 : i32, i32, i32
  }
}

</mosaic_0001>

<bundles_post_ra>
// kernel: language_model_forward.10
= control target key start
LH: loop header
LB: loop body
LE: loop exit
PB: predicated region body
PF: predicated region fallthrough
CT: control target
= control target key end

     0   :  { %s453_s15 = smov 0   ;;  %s455_s16 = smov 0   ;;  %s498_s0 = inlined_call_operand.vmem [shape: f32[2,8,32], index: 0, kind: input, shape index: {}]   ;;  %s499_s1 = inlined_call_operand.vmem [shape: f32[8,32], index: 1, kind: input, shape index: {}]   ;;  %s500_s2 = inlined_call_operand.vmem [shape: f32[1,32], index: 2, kind: input, shape index: {}]   ;;  %s501_s3 = inlined_call_operand.vmem [shape: f32[1,32], index: 3, kind: input, shape index: {}]   ;;  %s502_s4 = inlined_call_operand.vmem [shape: f32[2,8,32], index: 4, kind: output, shape index: {}]  }
   0x1   :  { %s457_s17 = smov 0  }
   0x2 LB: > { %s26_s18 = sadd.s32 1, %s422_s16  ;;  %p371_p0 = scmp.ge.s32.totalorder %s426_s17, 1  ;;  %s426_s17 = sphi %s457_s17, %s14_s17   ;;  %s422_s16 = sphi %s455_s16, %s504_s16   ;;  %s418_s15 = sphi %s453_s15, %s503_s15  }
   0x3   : > { %p28_p1 = scmp.ge.s32.totalorder %s26_s18, 2  ;;  %p189_p2 = scmp.lt.s32.totalorder %s426_s17, 3 }
   0x5   : > { %s506_s18 = smov (%p28_p1, %s26_s18), 0  ;;  %p190_p3 = pnand %p371_p0, %p189_p2 }
   0x6   : > { %p223_p4 = scmp.lt.s32.totalorder (!%p190_p3), %s418_s15, 1  ;;  %v242_v0 = vld [vmem:[%s499_s1] sm:$0xff] (!%p190_p3)  ;;  %vm246_vm0 = vcmask (!%p190_p3), 261120  }
   0x7   : > { %193 = sbr.rel (%p190_p3) target bundleno = 334 (0x14e), region = 36  ;;  %v374_v13 = vld [vmem:[%s500_s2] ss:$0 sm:$0xff] (!%p190_p3) }
   0x8   : > { %v375_v15 = vld [vmem:[%s501_s3] ss:$0 sm:$0xff] (!%p190_p3) }
   0xe   : > { %s508_s15 = smov (!%p223_p4, %s418_s15), 1 }
   0xf   : > { %s372_s19 = sshll.u32 %s508_s15, 3 }
  0x10   : > { %s229_s24 = scalar_lea.vmem %s498_s0, %s372_s19  ;;  %s240_s5 = scalar_lea.vmem %s502_s4, %s372_s19 }
  0x11   : > { %v241_v1 = vld [vmem:[%s229_s24] sm:$0xff] }
  0x12   : > { %v243_v2 = vadd.f32 %v242_v0, %v241_v1 }
  0x14   : > { %v247_v3 = vsel %vm246_vm0, %v243_v2, 0.0 }
  0x15   : > { %248 = vadd.xlane.f32.xlu0 %v247_v3 }
  0xa2   : > { %v249_v4 = vpop.xlane.xlu0 %248 }
  0xa3   : > { %v251_v5 = vmul.f32 0.03125, %v249_v4 }
  0xa5   : > { %v252_v6 = vsub.f32 %v243_v2, %v251_v5 }
  0xa7   : > { %v253_v7 = vmul.f32 %v252_v6, %v252_v6 }
  0xa9   : > { %v254_v8 = vsel %vm246_vm0, %v253_v7, 0.0 }
  0xaa   : > { %255 = vadd.xlane.f32.xlu0 %v254_v8 }
 0x137   : > { %v256_v9 = vpop.xlane.xlu0 %255 }
 0x138   : > { %v257_v10 = vmul.f32 0.03125, %v256_v9 }
 0x13a   : > { %v258_v11 = vadd.f32 1e-05, %v257_v10 }
 0x13c   : > { %402 = vrsqrt.f32 %v258_v11 }
 0x146   : > { %v403_v12 = vpop.eup %402 }
 0x147   : > { %v260_v14 = vmul.f32 %v403_v12, %v252_v6 }
 0x149   : > { %v267_v16 = vmul.f32 %v374_v13, %v260_v14 }
 0x14b   : > { %v274_v17 = vadd.f32 %v375_v15, %v267_v16 }
 0x14d   : > { %275 = vst.msk [vmem:[%s240_s5] sm:$0xff] %vm246_vm0, %v274_v17 }
 0x14e PF: > { %s14_s17 = sadd.s32 1, %s426_s17   ;;  %s503_s15 = smov %s422_s16 }
 0x14f   : > { %p11_p5 = scmp.ge.s32.totalorder %s14_s17, 4   ;;  %s504_s16 = smov %s506_s18 }
 0x151   :  { %13 = sbr.rel (!%p11_p5) target bundleno = 2 (0x2), region = 69 }

// kernel: language_model_forward.11
= control target key start
LH: loop header
LB: loop body
LE: loop exit
PB: predicated region body
PF: predicated region fallthrough
CT: control target
= control target key end

     0   :  { %s1219_s30 = smov 0   ;;  %s1221_s10 = smov 0   ;;  %s1311_s0 = inlined_call_operand.vmem [shape: f32[2,8,32], index: 0, kind: input, shape index: {}]   ;;  %s1312_s1 = inlined_call_operand.vmem [shape: bf16[4,32,8], index: 1, kind: input, shape index: {}]   ;;  %s1313_s2 = inlined_call_operand.vmem [shape: bf16[4,32,8], index: 2, kind: input, shape index: {}]   ;;  %s1314_s3 = inlined_call_operand.vmem [shape: bf16[4,32,8], index: 3, kind: input, shape index: {}]   ;;  %s1315_s4 = inlined_call_operand.vmem [shape: f32[4,1,8], index: 4, kind: input, shape index: {}]   ;;  %s1316_s5 = inlined_call_operand.vmem [shape: f32[4,1,8], index: 5, kind: input, shape index: {}]   ;;  %s1317_s6 = inlined_call_operand.vmem [shape: f32[4,1,8], index: 6, kind: input, shape index: {}]   ;;  %s1318_s7 = inlined_call_operand.vmem [shape: bf16[2,4,8,8], index: 7, kind: output, shape index: {0}]   ;;  %s1319_s8 = inlined_call_operand.vmem [shape: bf16[2,4,8,8], index: 8, kind: output, shape index: {1}]   ;;  %s1320_s9 = inlined_call_operand.vmem [shape: bf16[2,4,8,8], index: 9, kind: output, shape index: {2}]  }
   0x1   :  { %s1223_s11 = smov 0   ;;  %s1225_s12 = smov 0  }
   0x2   :  { %s1227_s13 = smov 0  }
   0x3 LB: > { %s32_s14 = sadd.s32 1, %s1157_s11  ;;  %s39_s15 = sadd.s32 1, %s1161_s12  ;;  %s1165_s13 = sphi %s1227_s13, %s20_s13   ;;  %s1161_s12 = sphi %s1225_s12, %s1324_s12   ;;  %s1157_s11 = sphi %s1223_s11, %s1323_s11   ;;  %s1153_s10 = sphi %s1221_s10, %s1322_s10   ;;  %s1149_s30 = sphi %s1219_s30, %s1321_s30  }
   0x4   : > { %p33_p0 = scmp.ge.s32.totalorder %s32_s14, 4  ;;  %p1015_p1 = scmp.ge.s32.totalorder %s1165_s13, 1 }
   0x5   : > { %p381_p2 = scmp.lt.s32.totalorder %s1165_s13, 9 }
   0x6   : > { %s1326_s14 = smov (%p33_p0, %s32_s14), 0  ;;  %s1328_s15 = smov (!%p33_p0, %s39_s15), %s1161_s12 }
   0x7   : > { %p382_p3 = pnand %p1015_p1, %p381_p2  ;;  %p41_p4 = scmp.ge.s32.totalorder %s1328_s15, 2 }
   0x8   : > { %p478_p5 = scmp.lt.s32.totalorder (!%p382_p3), %s1149_s30, 3  ;;  %p471_p6 = scmp.lt.s32.totalorder (!%p382_p3), %s1153_s10, 1  ;;  %v1167_v0 = vmov (!%p382_p3), 0.0   ;;  %vm1168_vm0 = vmmov (!%p382_p3), 0   ;;  %vm561_vm1 = vcmask (!%p382_p3), 261120   ;;  %vm732_vm2 = vcmask (!%p382_p3), 60416  }
   0x9   : > { %s1330_s15 = smov (%p41_p4, %s1328_s15), 0  ;;  %385 = sbr.rel (%p382_p3) target bundleno = 252 (0xfc), region = 48 }
   0xa   : > { %1055 = vmatprep.subr.bf16.mxu0 (!%p382_p3), %v1167_v0  ;;  %1063 = vmatprep.subr.bf16.mxu1 (!%p382_p3), %v1167_v0 }
   0xb   : > { %1059 = vmatprep.mubr.msk.bf16.mxu0 (!%p382_p3), %vm1168_vm0, %v1167_v0  ;;  %1067 = vmatprep.mubr.msk.bf16.mxu1 (!%p382_p3), %vm1168_vm0, %v1167_v0 }
  0x10   : > { %s1332_s30 = smov (!%p478_p5, %s1149_s30), 3  ;;  %s1334_s10 = smov (!%p471_p6, %s1153_s10), 1 }
  0x11   : > { %s1043_s16 = sshll.u32 %s1332_s30, 4  ;;  %s1016_s23 = sshll.u32 %s1334_s10, 3 }
  0x12   : > { %s482_s19 = scalar_lea.vmem %s1312_s1, %s1043_s16  ;;  %s487_s22 = scalar_lea.vmem %s1313_s2, %s1043_s16 }
  0x13   : > { %v1121_v1 = vld [vmem:[%s482_s19] sm:$0xff]   ;;  %v1122_v2 = vld [vmem:[%s482_s19 + $0x8] sm:$0xff]   ;;  %s477_s26 = scalar_lea.vmem %s1311_s0, %s1016_s23  ;;  %s492_s29 = scalar_lea.vmem %s1314_s3, %s1043_s16 }
  0x14   : > { %1056 = vmatpush3.bf16.msra.mxu0 %v1121_v1  ;;  %v1123_v3 = vld [vmem:[%s487_s22] sm:$0xff]   ;;  %v1125_v6 = vld [vmem:[%s487_s22 + $0x8] sm:$0xff]   ;;  %s1023_s16 = sshll.u32 %s1334_s10, 2  ;;  %s495_s19 = scalar_lea.vmem %s1315_s4, %s1332_s30 }
  0x15   : > { %1057 = vmatprep.subr.bf16.mxu0 %v1167_v0  ;;  %v536_v4 = vld [vmem:[%s477_s26] sm:$0xff]  ;;  %1064 = vmatpush3.bf16.msra.mxu1 %v1123_v3  ;;  %v1126_v8 = vld [vmem:[%s492_s29 + $0x8] sm:$0xff]   ;;  %s510_s20 = sadd.s32 %s1023_s16, %s1332_s30  ;;  %s498_s23 = scalar_lea.vmem %s1316_s5, %s1332_s30 }
  0x16   : > { %v537_v5 = vpack.c.bf16 %v536_v4, %v536_v4  ;;  %1065 = vmatprep.subr.bf16.mxu1 %v1167_v0  ;;  %v1124_v7 = vld [vmem:[%s492_s29] sm:$0xff]   ;;  %s1024_s24 = sshll.u32 %s510_s20, 2  ;;  %s501_s29 = scalar_lea.vmem %s1317_s6, %s1332_s30 }
  0x17   : > { %v1029_v9 = vld [vmem:[%s495_s19] ss:$0 sm:$0xff]  ;;  %s512_s10 = scalar_lea.vmem %s1318_s7, %s1024_s24  ;;  %s523_s18 = scalar_lea.vmem %s1319_s8, %s1024_s24 }
  0x18   : > { %1058 = vmatpush3.bf16.msra.mxu0 %v1122_v2  ;;  %v1033_v11 = vld [vmem:[%s498_s23] ss:$0 sm:$0xff]  ;;  %s534_s21 = scalar_lea.vmem %s1320_s9, %s1024_s24 }
  0x19   : > { %1071 = vmatprep.subr.bf16.mxu0 %v1167_v0  ;;  %1066 = vmatpush3.bf16.msra.mxu1 %v1125_v6  ;;  %v1037_v23 = vld [vmem:[%s501_s29] ss:$0 sm:$0xff] }
  0x1b   : > { %1060 = vmatmul.mubr.msk.bf16.vlgmr.msra.gmra.mrb[0].mxu0 %vm561_vm1, %v537_v5 }
  0x1c   : > { %1072 = vmatpush3.bf16.msra.mxu0 %v1124_v7  ;;  %1075 = vmatprep.mubr.msk.bf16.mxu0 %vm1168_vm0, %v1167_v0 }
  0x1d   : > { %1073 = vmatprep.subr.bf16.mxu0 %v1167_v0  ;;  %1068 = vmatmul.mubr.msk.bf16.vlgmr.msra.gmra.mrb[0].mxu1 %vm561_vm1, %v537_v5 }
  0x20   : > { %1074 = vmatpush3.bf16.msra.mxu0 %v1126_v8 }
  0x23   : > { %1076 = vmatmul.mubr.msk.bf16.vlgmr.msra.gmra.mrb[4].mxu0 %vm561_vm1, %v537_v5 }
  0xee   : > { %v599_v10 = vpop.f32.mrb[0].mxu0 }
  0xef   : > { %v600_v12 = vadd.f32 %v1029_v9, %v599_v10  ;;  %v1061_v13 = vpop.f32.mrb[1].mxu0 }
  0xf0   : > { %v602_v14 = vpop.f32.mrb[2].mxu0  ;;  %v662_v15 = vpop.f32.mrb[0].mxu1 }
  0xf1   : > { %v731_v16 = vpack.c.bf16 %v600_v12, %v600_v12  ;;  %v1062_v17 = vpop.f32.mrb[3].mxu0  ;;  %v663_v18 = vadd.f32 %v1033_v11, %v662_v15  ;;  %v1069_v19 = vpop.f32.mrb[1].mxu1 }
  0xf2   : > { %v665_v20 = vpop.f32.mrb[2].mxu1 }
  0xf3   : > { %733 = vst.msk [vmem:[%s512_s10] sm:$0xf] %vm732_vm2, %v731_v16  ;;  %v734_v21 = vpack.c.bf16 %v663_v18, %v663_v18  ;;  %v1070_v22 = vpop.f32.mrb[3].mxu1 }
  0xf5   : > { %735 = vst.msk [vmem:[%s523_s18] sm:$0xf] %vm732_vm2, %v734_v21 }
  0xf6   : > { %v725_v24 = vpop.f32.mrb[4].mxu0 }
  0xf7   : > { %v726_v25 = vadd.f32 %v1037_v23, %v725_v24  ;;  %v1077_v26 = vpop.f32.mrb[5].mxu0 }
  0xf8   : > { %v728_v27 = vpop.f32.mrb[6].mxu0 }
  0xf9   : > { %v736_v28 = vpack.c.bf16 %v726_v25, %v726_v25  ;;  %v1078_v29 = vpop.f32.mrb[7].mxu0 }
  0xfb   : > { %737 = vst.msk [vmem:[%s534_s21] sm:$0xf] %vm732_vm2, %v736_v28 }
  0xfc PF: > { %s20_s13 = sadd.s32 1, %s1165_s13   ;;  %s1321_s30 = smov %s1157_s11 }
  0xfd   : > { %p17_p7 = scmp.ge.s32.totalorder %s20_s13, 10   ;;  %s1322_s10 = smov %s1161_s12 }
  0xfe   : > { %s1323_s11 = smov %s1326_s14  ;;  %s1324_s12 = smov %s1330_s15 }
  0xff   :  { %19 = sbr.rel (!%p17_p7) target bundleno = 3 (0x3), region = 120 }

// kernel: language_model_forward.12
= control target key start
LH: loop header
LB: loop body
LE: loop exit
PB: predicated region body
PF: predicated region fallthrough
CT: control target
= control target key end

     0   :  { %s772_s12 = smov 0   ;;  %s774_s13 = smov 0   ;;  %s846_s0 = inlined_call_operand.vmem [shape: bf16[2,4,8,8], index: 0, kind: input, shape index: {}]   ;;  %s847_s1 = inlined_call_operand.vmem [shape: bf16[2,4,8,8], index: 1, kind: input, shape index: {}]   ;;  %s848_s2 = inlined_call_operand.vmem [shape: bf16[2,4,8,8], index: 2, kind: input, shape index: {}]   ;;  %s849_s3 = inlined_call_operand.vmem [shape: bf16[2,4,8,8], index: 3, kind: output, shape index: {}]  }
   0x1   :  { %s776_s14 = smov 0   ;;  %s778_s15 = smov 0  }
   0x2   :  { %s780_s16 = smov 0  }
   0x3 LB: > { %s35_s17 = sadd.s32 1, %s738_s14  ;;  %s39_s18 = sadd.s32 1, %s742_s15  ;;  %s746_s16 = sphi %s780_s16, %s13_s16   ;;  %s742_s15 = sphi %s778_s15, %s853_s15   ;;  %s738_s14 = sphi %s776_s14, %s852_s14   ;;  %s734_s13 = sphi %s774_s13, %s851_s13   ;;  %s730_s12 = sphi %s772_s12, %s850_s12  }
   0x4   : > { %p37_p0 = scmp.ge.s32.totalorder %s35_s17, 4  ;;  %p627_p1 = scmp.ge.s32.totalorder %s746_s16, 1 }
   0x5   : > { %p217_p2 = scmp.lt.s32.totalorder %s746_s16, 9 }
   0x6   : > { %s855_s17 = smov (%p37_p0, %s35_s17), 0  ;;  %s857_s18 = smov (!%p37_p0, %s39_s18), %s742_s15 }
   0x7   : > { %p218_p3 = pnand %p627_p1, %p217_p2  ;;  %p41_p4 = scmp.ge.s32.totalorder %s857_s18, 2 }
   0x8   : > { %p275_p5 = scmp.lt.s32.totalorder (!%p218_p3), %s734_s13, 1  ;;  %p277_p6 = scmp.lt.s32.totalorder (!%p218_p3), %s730_s12, 3  ;;  %vm327_vm0 = vcmask (!%p218_p3), 64512   ;;  %v748_v0 = vmov (!%p218_p3), 0.0   ;;  %vm749_vm1 = vmmov (!%p218_p3), 0   ;;  %vm324_vm2 = vcmask (!%p218_p3), 7168  }
   0x9   : > { %s859_s18 = smov (%p41_p4, %s857_s18), 0  ;;  %221 = sbr.rel (%p218_p3) target bundleno = 827 (0x33b), region = 32 }
   0xa   : > { %644 = vmatprep.subr.bf16.mxu0 (!%p218_p3), %v748_v0  ;;  %328 = vst.msk [vmem:[#allocation4] sm:$0xff] (!%p218_p3), %vm327_vm0, %v748_v0  ;;  %646 = vmatprep.mubr.msk.bf16.mxu0 (!%p218_p3), %vm749_vm1, %v748_v0  ;;  %v750_v4 = vmov (!%p218_p3), -inf   ;;  %v751_v10 = vmov (!%p218_p3), 0   ;;  %vm414_vm3 = vcmask (!%p218_p3), 1043456   ;;  %vm474_vm4 = vcmask (!%p218_p3), 60416  }
   0xb   : > { %650 = vmatprep.subr.bf16.mxu1 (!%p218_p3), %v748_v0  ;;  %652 = vmatprep.mubr.msk.bf16.mxu1 (!%p218_p3), %vm749_vm1, %v748_v0  ;;  %325 = vst.msk [vmem:[#allocation2] sm:$0xff] (!%p218_p3), %vm324_vm2, %v750_v4  ;;  %326 = vst.msk [vmem:[#allocation3] sm:$0xff] (!%p218_p3), %vm324_vm2, %v748_v0 }
   0xc   : > { %700 = vset.pattern.permute.xlu0 (!%p218_p3), %v751_v10  ;;  %701 = vset.pattern.permute.xlu1 (!%p218_p3), %v751_v10 }
  0x10   : > { %s861_s13 = smov (!%p275_p5, %s734_s13), 1  ;;  %s863_s12 = smov (!%p277_p6, %s730_s12), 3 }
  0x11   : > { %s628_s19 = sshll.u32 %s861_s13, 2  ;;  %v403_v31 = vld [vmem:[#allocation4] sm:$0xff] }
  0x12   : > { %s283_s20 = sadd.s32 %s628_s19, %s863_s12  ;;  %v379_v11 = vld [vmem:[#allocation2] sm:$0xff]  ;;  %v395_v25 = vld [vmem:[#allocation3] sm:$0xff] }
  0x13   : > { %s803_s21 = sshll.u32 %s283_s20, 2 }
  0x14   : > { %s296_s24 = scalar_lea.vmem %s847_s1, %s803_s21  ;;  %s285_s27 = scalar_lea.vmem %s846_s0, %s803_s21 }
  0x15   : > { %v330_v1 = vld [vmem:[%s296_s24] sm:$0xf]  ;;  %s307_s30 = scalar_lea.vmem %s848_s2, %s803_s21  ;;  %s318_s6 = scalar_lea.vmem %s849_s3, %s803_s21 }
  0x16   : > { %v337_v2 = vsel %vm327_vm0, %v330_v1, 0  ;;  %v329_v3 = vld [vmem:[%s285_s27] sm:$0xf] }
  0x17   : > { %645 = vmatpush3.bf16.xpose.msra.mxu0 %v337_v2  ;;  %v331_v15 = vld [vmem:[%s307_s30] sm:$0xf] }
  0x18   : > { %v416_v16 = vsel %vm414_vm3, %v331_v15, 0 }
  0x19   : > { %651 = vmatpush3.bf16.msra.mxu1 %v416_v16 }
  0x1e   : > { %647 = vmatmul.mubr.msk.bf16.vlgmr.msra.gmra.mrb[0].mxu0 %vm327_vm0, %v329_v3 }
  0xf1   : > { %v373_v5 = vpop.f32.mrb[0].mxu0 }
  0xf2   : > { %v648_v6 = vpop.f32.mrb[1].mxu0  ;;  %v380_v7 = vsel %vm327_vm0, %v373_v5, -inf }
  0xf3   : > { %381 = vmax.xlane.f32.xlu0 %v380_v7  ;;  %v376_v8 = vpop.f32.mrb[2].mxu0 }
  0xf4   : > { %v649_v9 = vpop.f32.mrb[3].mxu0 }
 0x180   : > { %v382_v12 = vpop.xlane.xlu0 %381 }
 0x181   : > { %v383_v13 = vmax.f32 %v379_v11, %v382_v12 }
 0x183   : > { %v384_v14 = vsub.f32 %v379_v11, %v383_v13  ;;  %460 = vst.msk [vmem:[#allocation2] sm:$0xff] %vm324_vm2, %v383_v13  ;;  %389 = vperm.xlu0 %700, %v383_v13  }
 0x185   : > { %v385_v23 = vmul.f32 1.442695, %v384_v14 }
 0x202   : > { %v390_v17 = vpop.permute.xlu0 %389 }
 0x203   : > { %v392_v18 = vsub.f32 %v373_v5, %v390_v17 }
 0x205   : > { %v393_v19 = vmul.f32 1.442695, %v392_v18 }
 0x207   : > { %702 = vpow2.f32 %v393_v19 }
 0x208   : > { %704 = vpow2.f32 %v385_v23 }
 0x211   : > { %v703_v20 = vpop.eup %702 }
 0x212   : > { %v397_v21 = vsel %vm327_vm0, %v703_v20, 0.0  ;;  %v410_v22 = vpack.c.bf16 %v703_v20, %v703_v20  ;;  %v705_v24 = vpop.eup %704 }
 0x213   : > { %398 = vadd.xlane.f32.xlu1 %v397_v21  ;;  %v396_v26 = vmul.f32 %v705_v24, %v395_v25 }
 0x214   : > { %653 = vmatmul.mubr.msk.bf16.vlgmr.msra.gmra.mrb[0].mxu1 %vm327_vm0, %v410_v22 }
 0x224   : > { %406 = vperm.xlu1 %701, %v705_v24  }
 0x2a0   : > { %v399_v27 = vpop.xlane.xlu1 %398 }
 0x2a1   : > { %v400_v28 = vadd.f32 %v399_v27, %v396_v26 }
 0x2a3   : > { %402 = vst.msk [vmem:[#allocation3] sm:$0xff] %vm324_vm2, %v400_v28 }
 0x2a4   : > { %v407_v32 = vpop.permute.xlu1 %406 }
 0x2a5   : > { %v409_v33 = vmul.f32 %v407_v32, %v403_v31 }
 0x2aa   : > { %v464_v29 = vld [vmem:[#allocation3] sm:$0xff] }
 0x2ab   : > { %706 = vrcp.f32 %v464_v29 }
 0x2b5   : > { %v707_v30 = vpop.eup %706 }
 0x2b6   : > { %469 = vperm.xlu1 %701, %v707_v30  }
 0x2e7   : > { %v452_v34 = vpop.f32.mrb[0].mxu1 }
 0x2e8   : > { %v458_v35 = vadd.f32 %v452_v34, %v409_v33  ;;  %v654_v36 = vpop.f32.mrb[1].mxu1 }
 0x2e9   : > { %v455_v37 = vpop.f32.mrb[2].mxu1 }
 0x2ea   : > { %459 = vst.msk [vmem:[#allocation4] sm:$0xff] %vm327_vm0, %v458_v35  ;;  %v655_v38 = vpop.f32.mrb[3].mxu1 }
 0x2f1   : > { %v466_v39 = vld [vmem:[#allocation4] sm:$0xff] }
 0x335   : > { %v470_v40 = vpop.permute.xlu1 %469 }
 0x336   : > { %v472_v41 = vmul.f32 %v470_v40, %v466_v39 }
 0x338   : > { %v473_v42 = vpack.c.bf16 %v472_v41, %v472_v41 }
 0x33a   : > { %475 = vst.msk [vmem:[%s318_s6] sm:$0xf] %vm474_vm4, %v473_v42 }
 0x33b PF: > { %s13_s16 = sadd.s32 1, %s746_s16   ;;  %s850_s12 = smov %s738_s14 }
 0x33c   : > { %p10_p7 = scmp.ge.s32.totalorder %s13_s16, 10   ;;  %s851_s13 = smov %s742_s15 }
 0x33d   : > { %s852_s14 = smov %s855_s17  ;;  %s853_s15 = smov %s859_s18 }
 0x33e   :  { %12 = sbr.rel (!%p10_p7) target bundleno = 3 (0x3), region = 76 }

// kernel: language_model_forward.13
= control target key start
LH: loop header
LB: loop body
LE: loop exit
PB: predicated region body
PF: predicated region fallthrough
CT: control target
= control target key end

     0   :  { %s884_s21 = smov 0   ;;  %s886_s22 = smov 0   ;;  %s958_s0 = inlined_call_operand.vmem [shape: f32[2,8,32], index: 0, kind: input, shape index: {}]   ;;  %s959_s1 = inlined_call_operand.vmem [shape: bf16[2,4,8,8], index: 1, kind: input, shape index: {}]   ;;  %s960_s2 = inlined_call_operand.vmem [shape: bf16[4,8,32], index: 2, kind: input, shape index: {}]   ;;  %s961_s3 = inlined_call_operand.vmem [shape: f32[1,32], index: 3, kind: input, shape index: {}]   ;;  %s962_s4 = inlined_call_operand.vmem [shape: f32[1,32], index: 4, kind: input, shape index: {}]   ;;  %s963_s5 = inlined_call_operand.vmem [shape: f32[1,32], index: 5, kind: input, shape index: {}]   ;;  %s964_s6 = inlined_call_operand.vmem [shape: f32[2,8,32], index: 6, kind: output, shape index: {}]  }
   0x1   :  { %s888_s23 = smov 0  }
   0x2 LB: > { %s35_s24 = sadd.s32 1, %s841_s22  ;;  %p732_p0 = scmp.ge.s32.totalorder %s845_s23, 1  ;;  %s845_s23 = sphi %s888_s23, %s16_s23   ;;  %s841_s22 = sphi %s886_s22, %s966_s22   ;;  %s837_s21 = sphi %s884_s21, %s965_s21  }
   0x3   : > { %p37_p1 = scmp.ge.s32.totalorder %s35_s24, 2  ;;  %p270_p2 = scmp.lt.s32.totalorder %s845_s23, 3 }
   0x5   : > { %s968_s24 = smov (%p37_p1, %s35_s24), 0  ;;  %p271_p3 = pnand %p732_p0, %p270_p2 }
   0x6   : > { %v363_v0 = vld [vmem:[%s960_s2] sm:$0xf] (!%p271_p3)  ;;  %vm368_vm0 = vcmask (!%p271_p3), 1043456   ;;  %v742_v1 = vld [vmem:[%s960_s2 + $0x8] sm:$0xf] (!%p271_p3)  ;;  %v847_v2 = vmov (!%p271_p3), 0.0  }
   0x7   : > { %274 = sbr.rel (%p271_p3) target bundleno = 572 (0x23c), region = 44  ;;  %761 = vmatprep.subr.bf16.mxu1 (!%p271_p3), %v847_v2  ;;  %v370_v3 = vsel (!%p271_p3), %vm368_vm0, %v363_v0, 0  ;;  %773 = vmatprep.subr.bf16.mxu0 (!%p271_p3), %v847_v2  ;;  %v472_v4 = vsel (!%p271_p3), %vm368_vm0, %v742_v1, 0  ;;  %p321_p4 = scmp.lt.s32.totalorder (!%p271_p3), %s837_s21, 1  ;;  %vm359_vm1 = vcmask (!%p271_p3), 261120   ;;  %vm848_vm2 = vmmov (!%p271_p3), 0  }
   0x8   : > { %762 = vmatpush3.bf16.msra.mxu1 (!%p271_p3), %v370_v3  ;;  %774 = vmatpush3.bf16.msra.mxu0 (!%p271_p3), %v472_v4  ;;  %v739_v5 = vld [vmem:[%s960_s2 + $0x4] sm:$0xf] (!%p271_p3)  ;;  %v745_v6 = vld [vmem:[%s960_s2 + $0xc] sm:$0xf] (!%p271_p3)  ;;  %360 = vst.msk [vmem:[#allocation2] sm:$0xff] (!%p271_p3), %vm359_vm1, %v847_v2  ;;  %vm364_vm3 = vcmask (!%p271_p3), 64512  }
   0x9   : > { %763 = vmatprep.mubr.msk.bf16.mxu1 (!%p271_p3), %vm848_vm2, %v847_v2  ;;  %767 = vmatprep.subr.bf16.mxu1 (!%p271_p3), %v847_v2  ;;  %v421_v7 = vsel (!%p271_p3), %vm368_vm0, %v739_v5, 0  ;;  %v523_v8 = vsel (!%p271_p3), %vm368_vm0, %v745_v6, 0  ;;  %v747_v26 = vld [vmem:[%s961_s3] ss:$0 sm:$0xff] (!%p271_p3) }
   0xa   : > { %775 = vmatprep.mubr.msk.bf16.mxu0 (!%p271_p3), %vm848_vm2, %v847_v2  ;;  %779 = vmatprep.subr.bf16.mxu0 (!%p271_p3), %v847_v2  ;;  %v748_v39 = vld [vmem:[%s962_s4] ss:$0 sm:$0xff] (!%p271_p3) }
   0xb   : > { %v749_v41 = vld [vmem:[%s963_s5] ss:$0 sm:$0xff] (!%p271_p3) }
   0xe   : > { %s970_s21 = smov (!%p321_p4, %s837_s21), 1 }
   0xf   : > { %s752_s9 = sshll.u32 %s970_s21, 4  ;;  %v361_v13 = vld [vmem:[#allocation2] sm:$0xff]  ;;  %s733_s13 = sshll.u32 %s970_s21, 3 }
  0x10   : > { %s339_s12 = scalar_lea.vmem %s959_s1, %s752_s9  ;;  %s327_s16 = scalar_lea.vmem %s958_s0, %s733_s13 }
  0x11   : > { %v362_v9 = vld [vmem:[%s339_s12] sm:$0xf]  ;;  %v741_v10 = vld [vmem:[%s339_s12 + $0x8] sm:$0xf]  ;;  %v738_v11 = vld [vmem:[%s339_s12 + $0x4] sm:$0xf]  ;;  %s353_s28 = scalar_lea.vmem %s964_s6, %s733_s13 }
  0x12   : > { %764 = vmatmul.mubr.msk.bf16.vlgmr.msra.gmra.mrb[0].mxu1 %vm364_vm3, %v362_v9  ;;  %776 = vmatmul.mubr.msk.bf16.vlgmr.msra.gmra.mrb[0].mxu0 %vm364_vm3, %v741_v10  ;;  %v744_v12 = vld [vmem:[%s339_s12 + $0xc] sm:$0xf]  ;;  %v571_v24 = vld [vmem:[%s327_s16] sm:$0xff] }
  0x13   : > { %768 = vmatpush3.bf16.msra.mxu1 %v421_v7  ;;  %780 = vmatpush3.bf16.msra.mxu0 %v523_v8 }
  0x14   : > { %769 = vmatprep.mubr.msk.bf16.mxu1 %vm848_vm2, %v847_v2  ;;  %781 = vmatprep.mubr.msk.bf16.mxu0 %vm848_vm2, %v847_v2 }
  0x1e   : > { %770 = vmatmul.mubr.msk.bf16.vlgmr.msra.gmra.mrb[0].mxu1 %vm364_vm3, %v738_v11  ;;  %782 = vmatmul.mubr.msk.bf16.vlgmr.msra.gmra.mrb[0].mxu0 %vm364_vm3, %v744_v12 }
  0xf1   : > { %v457_v14 = vpop.f32.mrb[0].mxu1  ;;  %v559_v15 = vpop.f32.mrb[0].mxu0 }
  0xf2   : > { %v785_v16 = vadd.f32 %v457_v14, %v361_v13  ;;  %v771_v17 = vpop.f32.mrb[1].mxu1  ;;  %v783_v18 = vpop.f32.mrb[1].mxu0 }
  0xf3   : > { %v460_v19 = vpop.f32.mrb[2].mxu1  ;;  %v562_v20 = vpop.f32.mrb[2].mxu0 }
  0xf4   : > { %v786_v21 = vadd.f32 %v785_v16, %v559_v15  ;;  %v772_v22 = vpop.f32.mrb[3].mxu1  ;;  %v784_v23 = vpop.f32.mrb[3].mxu0 }
  0xf6   : > { %567 = vst.msk [vmem:[#allocation2] sm:$0xff] %vm359_vm1, %v786_v21 }
  0xfd   : > { %v572_v25 = vld [vmem:[#allocation2] sm:$0xff] }
  0xfe   : > { %v573_v27 = vadd.f32 %v572_v25, %v571_v24 }
 0x100   : > { %v581_v28 = vadd.f32 %v747_v26, %v573_v27 }
 0x102   : > { %v584_v29 = vsel %vm359_vm1, %v581_v28, 0.0 }
 0x103   : > { %585 = vadd.xlane.f32.xlu0 %v584_v29 }
 0x190   : > { %v586_v30 = vpop.xlane.xlu0 %585 }
 0x191   : > { %v588_v31 = vmul.f32 0.03125, %v586_v30 }
 0x193   : > { %v589_v32 = vsub.f32 %v581_v28, %v588_v31 }
 0x195   : > { %v590_v33 = vmul.f32 %v589_v32, %v589_v32 }
 0x197   : > { %v591_v34 = vsel %vm359_vm1, %v590_v33, 0.0 }
 0x198   : > { %592 = vadd.xlane.f32.xlu0 %v591_v34 }
 0x225   : > { %v593_v35 = vpop.xlane.xlu0 %592 }
 0x226   : > { %v594_v36 = vmul.f32 0.03125, %v593_v35 }
 0x228   : > { %v595_v37 = vadd.f32 1e-05, %v594_v36 }
 0x22a   : > { %821 = vrsqrt.f32 %v595_v37 }
 0x234   : > { %v822_v38 = vpop.eup %821 }
 0x235   : > { %v597_v40 = vmul.f32 %v822_v38, %v589_v32 }
 0x237   : > { %v604_v42 = vmul.f32 %v748_v39, %v597_v40 }
 0x239   : > { %v611_v43 = vadd.f32 %v749_v41, %v604_v42 }
 0x23b   : > { %612 = vst.msk [vmem:[%s353_s28] sm:$0xff] %vm359_vm1, %v611_v43 }
 0x23c PF: > { %s16_s23 = sadd.s32 1, %s845_s23   ;;  %s965_s21 = smov %s841_s22 }
 0x23d   : > { %p13_p5 = scmp.ge.s32.totalorder %s16_s23, 4   ;;  %s966_s22 = smov %s968_s24 }
 0x23f   :  { %15 = sbr.rel (!%p13_p5) target bundleno = 2 (0x2), region = 94 }

// kernel: language_model_forward.19
= control target key start
LH: loop header
LB: loop body
LE: loop exit
PB: predicated region body
PF: predicated region fallthrough
CT: control target
= control target key end

     0   :  { %8 = vsyncpa [#allocation3], 0  ;;  %s731_s0 = inlined_call_operand.vmem [shape: f32[2,8,32], index: 0, kind: input, shape index: {}]   ;;  %s732_s1 = inlined_call_operand.vmem [shape: bf16[32,128], index: 1, kind: input, shape index: {}]   ;;  %s733_s2 = inlined_call_operand.vmem [shape: f32[1,128], index: 2, kind: input, shape index: {}]   ;;  %s734_s3 = inlined_call_operand.hbm [shape: f32[2,8,128], index: 3, kind: output, shape index: {}]  }
   0x1   :  { %10 = vsyncpa [#allocation3 + $0x1], 0  ;;  %s610_s12 = smov 0   ;;  %s612_s13 = smov 0  }
   0x2   :  { %s614_s14 = smov 0   ;;  %s616_s15 = smov 0  }
   0x3   :  { %s618_s16 = smov 0   ;;  %s620_s17 = smov 0  }
   0x4 LB: > { %s420_s18 = sadd.s32 4294967295, %s585_s17   ;;  %s421_s19 = sadd.s32 4294967294, %s585_s17   ;;  %s585_s17 = sphi %s620_s17, %s16_s17   ;;  %s581_s16 = sphi %s618_s16, %s741_s16   ;;  %s577_s15 = sphi %s616_s15, %s740_s15   ;;  %s573_s14 = sphi %s614_s14, %s739_s14   ;;  %s569_s13 = sphi %s612_s13, %s738_s13   ;;  %s565_s12 = sphi %s610_s12, %s737_s12  }
   0x5   : > { %s35_s20 = sadd.s32 1, %s581_s16  ;;  %s126_s21 = sadd.s32 1, %s573_s14 }
   0x6   : > { %p37_p0 = scmp.ge.s32.totalorder %s35_s20, 2  ;;  %p136_p1 = scmp.ne.s32.totalorder %s573_s14, %s569_s13 }
   0x7   : > { %p137_p2 = scmp.eq.s32.totalorder %s420_s18, 1  ;;  %p142_p3 = scmp.ne.s32.totalorder %s569_s13, %s565_s12 }
   0x8   : > { %s743_s20 = smov (%p37_p0, %s35_s20), 0  ;;  %p143_p5 = scmp.eq.s32.totalorder %s421_s19, 1 }
   0x9   : > { %p650_p4 = por %p137_p2, %p136_p1  ;;  %s119_s23 = ssub.s32 %s581_s16, %s743_s20 }
   0xa   : > { %p426_p6 = scmp.ge.s32.totalorder %s585_s17, 1  ;;  %p124_p7 = scmp.eq.s32.totalorder %s119_s23, 0 }
   0xb   : > { %p657_p8 = por %p143_p5, %p142_p3  ;;  %p184_p9 = scmp.lt.s32.totalorder %s585_s17, 3 }
   0xc   : > { %s663_s25 = scalar_select %p124_p7, %s573_s14, %s126_s21  }
   0xd   : > { %p185_p10 = pnand %p426_p6, %p184_p9 }
   0xe   : > { %v505_v0 = vld [vmem:[%s732_s1] sm:$0xff] (!%p185_p10)   ;;  %v587_v1 = vmov (!%p185_p10), 0.0   ;;  %v506_v2 = vld [vmem:[%s732_s1 + $0x8] sm:$0xff] (!%p185_p10)   ;;  %vm588_vm0 = vmmov (!%p185_p10), 0   ;;  %p217_p11 = scmp.lt.s32.totalorder (!%p185_p10), %s577_s15, 1  ;;  %vm257_vm1 = vcmask (!%p185_p10), 261120  }
   0xf   : > { %188 = sbr.rel (%p185_p10) target bundleno = 257 (0x101), region = 32  ;;  %440 = vmatprep.subr.bf16.mxu0 (!%p185_p10), %v587_v1  ;;  %444 = vmatprep.mubr.msk.bf16.mxu0 (!%p185_p10), %vm588_vm0, %v587_v1  ;;  %s214_s8 = sand.u32 (!%p185_p10), 1, %s569_s13   ;;  %v429_v5 = vld [vmem:[%s733_s2] ss:$0 sm:$0xff] (!%p185_p10) }
  0x10   : > { %441 = vmatpush3.bf16.msra.mxu0 (!%p185_p10), %v505_v0  ;;  %s427_s9 = sshll.u32 (!%p185_p10), %s214_s8, 3  ;;  %s434_s18 = sshll.u32 (!%p185_p10), %s577_s15, 7 }
  0x11   : > { %442 = vmatprep.subr.bf16.mxu0 (!%p185_p10), %v587_v1  ;;  %s216_s19 = scalar_lea.vmem (!%p185_p10), [#allocation2], %s427_s9  ;;  %s684_s27 = scalar_lea.hbm (!%p185_p10), %s734_s3, %s434_s18 }
  0x12   : > { %s318_s21 = sshll.u32 (!%p185_p10), %s216_s19, 4  ;;  %s303_s28 = scalar_lea.sflag (!%p185_p10), [#allocation3], %s214_s8  ;;  %s686_s21 = int_to_ptr.vmem [resolvable:$true] %s318_s21 }
  0x13   : > { %s589_s29 = smov (!%p185_p10), [#allocation2]  }
  0x14   : > { %443 = vmatpush3.bf16.msra.mxu0 (!%p185_p10), %v506_v2 }
  0x16   : > { %s218_s30 = scalar_select %p217_p11, %s577_s15, 1 }
  0x17   : > { %s507_s15 = scalar_lea.vmem %s686_s21, 128 }
  0x18   : > { %s428_s4 = sshll.u32 %s218_s30, 3  ;;  %p508_p12 = scmp.ne.s32.totalorder %s686_s21, %s507_s15 }
  0x19   : > { %s223_s7 = scalar_lea.vmem %s731_s0, %s428_s4  ;;  %s511_s30 = sshll.u32 %s589_s29, 4  ;;  %s512_s30 = int_to_ptr.vmem [resolvable:$false] %s511_s30 }
  0x1a   : > { %v232_v3 = vld [vmem:[%s223_s7] sm:$0xff]  ;;  %p509_p13 = pnand %p508_p12, %p650_p4  ;;  %s513_s4 = scalar_lea.vmem %s512_s30, 256 }
  0x1b   : > { %v233_v4 = vpack.c.bf16 %v232_v3, %v232_v3  ;;  %p514_p1 = scmp.lt.s32.totalorder %s686_s21, %s512_s30  ;;  %p515_p2 = scmp.lt.s32.totalorder %s513_s4, %s507_s15 }
  0x1c   : > { %p510_p0 = pneg %p509_p13 }
  0x1d   : > { %445 = vmatmul.mubr.msk.bf16.vlgmr.msra.gmra.mrb[0].mxu0 %vm257_vm1, %v233_v4  ;;  %p516_p3 = por %p515_p2, %p514_p1 }
  0x1f   : > { %p517_p5 = pnand %p516_p3, %p510_p0 }
  0xf0   : > { %v295_v6 = vpop.f32.mrb[0].mxu0 }
  0xf1   : > { %v296_v7 = vadd.f32 %v429_v5, %v295_v6  ;;  %v446_v8 = vpop.f32.mrb[1].mxu0 }
  0xf2   : > { %v298_v9 = vpop.f32.mrb[2].mxu0 }
  0xf3   : > { %301 = vst [vmem:[%s216_s19] sm:$0xff] %v296_v7  ;;  %v447_v10 = vpop.f32.mrb[3].mxu0 }
  0xf4   : > { %520 = shalt.err (!%p517_p5)
}
  0xf5   : > { %s521_s5 = scalar_lea.hbm %s684_s27, 128  ;;  %s525_s8 = scalar_lea.hbm %s734_s3, 256 }
  0xf6   : > { %p522_p6 = scmp.ne.s32.totalorder %s684_s27, %s521_s5  ;;  %p526_p10 = scmp.lt.u32.totalorder %s684_s27, %s734_s3 }
  0xf7   : > { %p527_p11 = scmp.lt.u32.totalorder %s525_s8, %s521_s5  ;;  %p529_p13 = scmp.lt.u32.totalorder %s521_s5, %s684_s27 }
  0xf8   : > { %p523_p7 = pnand %p522_p6, %p650_p4 }
  0xf9   : > { %p528_p12 = por %p527_p11, %p526_p10 }
  0xfa   : > { %p524_p9 = pneg %p523_p7 }
  0xfb   : > { %p530_p0 = por %p529_p13, %p528_p12 }
  0xfd   : > { %p531_p1 = pnand %p530_p0, %p524_p9 }
  0xff   : > { %534 = shalt.err (!%p531_p1)
}
 0x100   : > { %448 = dma.vmem_to_hbm [thread:$0]  (%p650_p4), %s686_s21, 128, %s684_s27, %s303_s28  }
 0x101 PF: > { %p454_p2 = scmp.ge.s32.totalorder %s585_s17, 2  ;;  %s330_s11 = sand.u32 1, %s565_s12  }
 0x102   : > { %s331_s18 = scalar_lea.sflag [#allocation3], %s330_s11 }
 0x103   : > { %p451_p3 = pnand %p454_p2, %p657_p8 }
 0x105   : > { %560 = dma.done.wait (!%p451_p3), %s331_s18, 128  }
 0x106   : > { %562 = vsyncadd (!%p451_p3), %s331_s18, 4294967168  ;;  %s16_s17 = sadd.s32 1, %s585_s17   ;;  %s737_s12 = smov %s569_s13 }
 0x107   : > { %p13_p5 = scmp.ge.s32.totalorder %s16_s17, 4   ;;  %s738_s13 = smov %s573_s14 }
 0x108   : > { %s739_s14 = smov %s663_s25  ;;  %s740_s15 = smov %s581_s16 }
 0x109   : > { %s741_s16 = smov %s743_s20  ;;  %15 = sbr.rel (!%p13_p5) target bundleno = 4 (0x4), region = 73 }
 0x110   :  { %336 = vsyncpa [#allocation3], 1 }
 0x111   :  { %338 = vsyncpa [#allocation3 + $0x1], 1 }

// kernel: language_model_forward.14
= control target key start
LH: loop header
LB: loop body
LE: loop exit
PB: predicated region body
PF: predicated region fallthrough
CT: control target
= control target key end

     0   :  { %s839_s24 = smov 0   ;;  %s841_s25 = smov 0   ;;  %s915_s0 = inlined_call_operand.vmem [shape: f32[2,8,32], index: 0, kind: input, shape index: {}]   ;;  %s916_s1 = inlined_call_operand.vmem [shape: bf16[32,64], index: 1, kind: input, shape index: {}]   ;;  %s917_s2 = inlined_call_operand.vmem [shape: f32[1,64], index: 2, kind: input, shape index: {}]   ;;  %s918_s3 = inlined_call_operand.vmem [shape: bf16[64,32], index: 3, kind: input, shape index: {}]   ;;  %s919_s4 = inlined_call_operand.vmem [shape: f32[1,32], index: 4, kind: input, shape index: {}]   ;;  %s920_s5 = inlined_call_operand.vmem [shape: f32[1,32], index: 5, kind: input, shape index: {}]   ;;  %s921_s6 = inlined_call_operand.vmem [shape: f32[1,32], index: 6, kind: input, shape index: {}]   ;;  %s922_s7 = inlined_call_operand.vmem [shape: f32[2,8,32], index: 7, kind: output, shape index: {}]  }
   0x1   :  { %s843_s26 = smov 0  }
   0x2 LB: > { %s36_s27 = sadd.s32 1, %s791_s25  ;;  %p694_p0 = scmp.ge.s32.totalorder %s795_s26, 1  ;;  %s795_s26 = sphi %s843_s26, %s17_s26   ;;  %s791_s25 = sphi %s841_s25, %s924_s25   ;;  %s787_s24 = sphi %s839_s24, %s923_s24  }
   0x3   : > { %p38_p1 = scmp.ge.s32.totalorder %s36_s27, 2  ;;  %p290_p2 = scmp.lt.s32.totalorder %s795_s26, 3 }
   0x5   : > { %s926_s27 = smov (%p38_p1, %s36_s27), 0  ;;  %p291_p3 = pnand %p694_p0, %p290_p2 }
   0x6   : > { %v765_v0 = vld [vmem:[%s916_s1] sm:$0xff] (!%p291_p3)   ;;  %v797_v1 = vmov (!%p291_p3), 0.0   ;;  %v766_v2 = vld [vmem:[%s916_s1 + $0x8] sm:$0xff] (!%p291_p3)   ;;  %vm798_vm0 = vmmov (!%p291_p3), 0   ;;  %p338_p4 = scmp.lt.s32.totalorder (!%p291_p3), %s787_s24, 1  ;;  %vm370_vm1 = vcmask (!%p291_p3), 261120  }
   0x7   : > { %294 = sbr.rel (%p291_p3) target bundleno = 778 (0x30a), region = 48  ;;  %719 = vmatprep.subr.bf16.mxu0 (!%p291_p3), %v797_v1  ;;  %727 = vmatprep.subr.bf16.mxu1 (!%p291_p3), %v797_v1  ;;  %371 = vst.msk [vmem:[#allocation2] sm:$0xff] (!%p291_p3), %vm370_vm1, %v797_v1  ;;  %v767_v3 = vld [vmem:[%s918_s3] sm:$0xff] (!%p291_p3)   ;;  %v768_v4 = vld [vmem:[%s918_s3 + $0x8] sm:$0xff] (!%p291_p3)   ;;  %v769_v7 = vld [vmem:[%s918_s3 + $0x10] sm:$0xff] (!%p291_p3)   ;;  %vm476_vm2 = vcmask (!%p291_p3), 523264  }
   0x8   : > { %720 = vmatpush3.bf16.msra.mxu0 (!%p291_p3), %v765_v0  ;;  %723 = vmatprep.mubr.msk.bf16.mxu0 (!%p291_p3), %vm798_vm0, %v797_v1  ;;  %v770_v8 = vld [vmem:[%s918_s3 + $0x18] sm:$0xff] (!%p291_p3)   ;;  %v697_v9 = vld [vmem:[%s917_s2] ss:$0 sm:$0xff] (!%p291_p3) }
   0x9   : > { %721 = vmatprep.subr.bf16.mxu0 (!%p291_p3), %v797_v1  ;;  %735 = vmatprep.mubr.msk.bf16.mxu1 (!%p291_p3), %vm798_vm0, %v797_v1  ;;  %v706_v24 = vld [vmem:[%s919_s4] ss:$0 sm:$0xff] (!%p291_p3) }
   0xa   : > { %728 = vmatpush3.bf16.msra.mxu1 (!%p291_p3), %v767_v3  ;;  %v707_v37 = vld [vmem:[%s920_s5] ss:$0 sm:$0xff] (!%p291_p3) }
   0xb   : > { %729 = vmatprep.subr.bf16.mxu1 (!%p291_p3), %v797_v1  ;;  %v708_v39 = vld [vmem:[%s921_s6] ss:$0 sm:$0xff] (!%p291_p3) }
   0xc   : > { %722 = vmatpush3.bf16.msra.mxu0 (!%p291_p3), %v766_v2 }
   0xe   : > { %s928_s24 = smov (!%p338_p4, %s787_s24), 1  ;;  %730 = vmatpush3.bf16.msra.mxu1 %v768_v4  ;;  %v442_v17 = vld [vmem:[#allocation2] sm:$0xff] }
   0xf   : > { %s695_s13 = sshll.u32 %s928_s24, 3  ;;  %731 = vmatprep.subr.bf16.mxu1 %v797_v1 }
  0x10   : > { %s344_s16 = scalar_lea.vmem %s915_s0, %s695_s13  ;;  %s364_s12 = scalar_lea.vmem %s922_s7, %s695_s13 }
  0x11   : > { %v372_v5 = vld [vmem:[%s344_s16] sm:$0xff] }
  0x12   : > { %v373_v6 = vpack.c.bf16 %v372_v5, %v372_v5  ;;  %732 = vmatpush3.bf16.msra.mxu1 %v769_v7 }
  0x13   : > { %733 = vmatprep.subr.bf16.mxu1 %v797_v1 }
  0x14   : > { %724 = vmatmul.mubr.msk.bf16.vlgmr.msra.gmra.mrb[0].mxu0 %vm370_vm1, %v373_v6 }
  0x16   : > { %734 = vmatpush3.bf16.msra.mxu1 %v770_v8 }
  0xe7   : > { %v435_v10 = vpop.f32.mrb[0].mxu0 }
  0xe8   : > { %v436_v11 = vadd.f32 %v697_v9, %v435_v10  ;;  %v725_v12 = vpop.f32.mrb[1].mxu0 }
  0xe9   : > { %v438_v13 = vpop.f32.mrb[2].mxu0 }
  0xea   : > { %v441_v14 = vmax.f32 %v436_v11, 0.0  ;;  %v726_v15 = vpop.f32.mrb[3].mxu0 }
  0xec   : > { %v443_v16 = vpack.c.bf16 %v441_v14, %v441_v14 }
  0xee   : > { %736 = vmatmul.mubr.msk.bf16.vlgmr.msra.gmra.mrb[0].mxu1 %vm476_vm2, %v443_v16 }
 0x1c1   : > { %v514_v18 = vpop.f32.mrb[0].mxu1 }
 0x1c2   : > { %v520_v19 = vadd.f32 %v514_v18, %v442_v17  ;;  %v737_v20 = vpop.f32.mrb[1].mxu1 }
 0x1c3   : > { %v517_v21 = vpop.f32.mrb[2].mxu1 }
 0x1c4   : > { %521 = vst.msk [vmem:[#allocation2] sm:$0xff] %vm370_vm1, %v520_v19  ;;  %v738_v22 = vpop.f32.mrb[3].mxu1 }
 0x1cb   : > { %v526_v23 = vld [vmem:[#allocation2] sm:$0xff] }
 0x1cc   : > { %v527_v25 = vadd.f32 %v526_v23, %v372_v5 }
 0x1ce   : > { %v535_v26 = vadd.f32 %v706_v24, %v527_v25 }
 0x1d0   : > { %v538_v27 = vsel %vm370_vm1, %v535_v26, 0.0 }
 0x1d1   : > { %539 = vadd.xlane.f32.xlu0 %v538_v27 }
 0x25e   : > { %v540_v28 = vpop.xlane.xlu0 %539 }
 0x25f   : > { %v542_v29 = vmul.f32 0.03125, %v540_v28 }
 0x261   : > { %v543_v30 = vsub.f32 %v535_v26, %v542_v29 }
 0x263   : > { %v544_v31 = vmul.f32 %v543_v30, %v543_v30 }
 0x265   : > { %v545_v32 = vsel %vm370_vm1, %v544_v31, 0.0 }
 0x266   : > { %546 = vadd.xlane.f32.xlu0 %v545_v32 }
 0x2f3   : > { %v547_v33 = vpop.xlane.xlu0 %546 }
 0x2f4   : > { %v548_v34 = vmul.f32 0.03125, %v547_v33 }
 0x2f6   : > { %v549_v35 = vadd.f32 1e-05, %v548_v34 }
 0x2f8   : > { %771 = vrsqrt.f32 %v549_v35 }
 0x302   : > { %v772_v36 = vpop.eup %771 }
 0x303   : > { %v551_v38 = vmul.f32 %v772_v36, %v543_v30 }
 0x305   : > { %v558_v40 = vmul.f32 %v707_v37, %v551_v38 }
 0x307   : > { %v565_v41 = vadd.f32 %v708_v39, %v558_v40 }
 0x309   : > { %566 = vst.msk [vmem:[%s364_s12] sm:$0xff] %vm370_vm1, %v565_v41 }
 0x30a PF: > { %s17_s26 = sadd.s32 1, %s795_s26   ;;  %s923_s24 = smov %s791_s25 }
 0x30b   : > { %p14_p5 = scmp.ge.s32.totalorder %s17_s26, 4   ;;  %s924_s25 = smov %s926_s27 }
 0x30d   :  { %16 = sbr.rel (!%p14_p5) target bundleno = 2 (0x2), region = 95 }

</bundles_post_ra>
